<compile_context>
chip_gen: v7x
topology: tpu7x:2x2x1
jax: 0.10.0
libtpu: 0.0.40
codegen_flags: <defaults>
</compile_context>

<pallas_src>
import functools

import jax
import jax.numpy as jnp
from jax.experimental import pallas as pl
from jax.experimental.pallas import tpu as pltpu


# ----------------------------------------------------------------------------
# helpers
# ----------------------------------------------------------------------------
def _round_up(n, m):
    return ((n + m - 1) // m) * m


def _pad2(a, rows, cols):
    r, c = a.shape
    if r == rows and c == cols:
        return a
    return jnp.pad(a, ((0, rows - r), (0, cols - c)))


def _largest_tile_dividing(dim_p, target):
    """Largest multiple of 128 that divides dim_p (a multiple of 128), <= target."""
    best, t = 128, 128
    while t <= min(target, dim_p):
        if dim_p % t == 0:
            best = t
        t += 128
    return best


def _choose_row_tiling(n_nodes, target_tile):
    """Pick (n_p, tile_n): n_p % tile_n == 0, n_p a multiple of 128, >= 2 row
    tiles (keeps both v7x TensorCores busy) and <= ~25% zero-row padding
    (padding blows up the O(N^2) adjacency traffic)."""
    n128 = _round_up(max(int(n_nodes), 1), 128)
    t = max(128, (min(target_tile, n128) // 128) * 128)
    while t >= 128:
        n_p = _round_up(n128, t)
        if n_p // t >= 2 and 4 * n_p <= 5 * n128:
            return n_p, t
        t -= 128
    # Tiny graph (n128 == 128): two 64-row tiles still feed both cores.
    return n128, max(8, n128 // 2)


def _vmem_capacity_bytes():
    try:
        return int(pltpu.get_tpu_info().vmem_capacity_bytes)
    except Exception:
        return 64 * 1024 * 1024  # conservative default (v7x per-core VMEM)


# ----------------------------------------------------------------------------
# kernel 1: support = X @ W   (row tiles x f_in tiles, f32 accumulator)
# ----------------------------------------------------------------------------
def _xw_kernel(x_ref, w_ref, o_ref, acc_ref):
    k = pl.program_id(1)

    @pl.when(k == 0)
    def _():
        acc_ref[...] = jnp.zeros_like(acc_ref)

    acc_ref[...] += jnp.dot(x_ref[...], w_ref[...],
                            preferred_element_type=jnp.float32)

    @pl.when(k == pl.num_programs(1) - 1)
    def _():
        o_ref[...] = acc_ref[...].astype(o_ref.dtype)


def _support_matmul(x_bf, w_bf, *, tile_m, tile_fk, vmem_limit):
    """x_bf: [N_p, f_in_p] bf16, w_bf: [f_in_p, f_out_p] bf16 -> [N_p, f_out_p] bf16."""
    n_p, f_in_p = x_bf.shape
    f_out_p = w_bf.shape[1]
    num_m = n_p // tile_m
    num_k = f_in_p // tile_fk
    flops = 2 * n_p * f_in_p * f_out_p
    w_reads = 1 if num_k == 1 else num_m  # constant index -> loaded once
    bytes_accessed = (n_p * f_in_p * 2 + w_reads * f_in_p * f_out_p * 2
                      + n_p * f_out_p * 2)
    return pl.pallas_call(
        _xw_kernel,
        out_shape=jax.ShapeDtypeStruct((n_p, f_out_p), jnp.bfloat16),
        grid_spec=pltpu.PrefetchScalarGridSpec(
            num_scalar_prefetch=0,
            grid=(num_m, num_k),
            in_specs=[
                pl.BlockSpec((tile_m, tile_fk), lambda i, k: (i, k)),    # x tile
                pl.BlockSpec((tile_fk, f_out_p), lambda i, k: (k, 0)),   # W k-slab
            ],
            out_specs=pl.BlockSpec((tile_m, f_out_p), lambda i, k: (i, 0)),
            scratch_shapes=[pltpu.VMEM((tile_m, f_out_p), jnp.float32)],
        ),
        compiler_params=pltpu.CompilerParams(
            dimension_semantics=("parallel", "arbitrary"),
            vmem_limit_bytes=vmem_limit),
        cost_estimate=pl.CostEstimate(
            flops=int(flops), transcendentals=0,
            bytes_accessed=int(bytes_accessed)),
    )(x_bf, w_bf)


# ----------------------------------------------------------------------------
# kernel 2: out = act((adj @ support) [@ W_fused] + b)
#   resident mode : support is one constant block kept in VMEM, no K axis
#   k-tiled mode  : (row, K) grid with f32 accumulator (big-graph fallback)
# ----------------------------------------------------------------------------
def _agg_kernel(*args, activation, has_w, ktiled):
    if has_w:
        adj_ref, s_ref, w_ref, b_ref, *rest = args
    else:
        adj_ref, s_ref, b_ref, *rest = args
        w_ref = None
    if ktiled:
        o_ref, acc_ref = rest
    else:
        (o_ref,) = rest

    def finalize(acc_f32):
        h = acc_f32
        if w_ref is not None:  # fused classifier: (adj @ h) @ W
            h = jnp.dot(h.astype(jnp.bfloat16), w_ref[...],
                        preferred_element_type=jnp.float32)
        h = h + b_ref[...]
        if activation == "relu":
            h = jnp.maximum(h, 0.0)
        elif activation == "sigmoid":
            # exp on the EUP + approximate reciprocal: off the VALU critical path
            h = pl.reciprocal(1.0 + jnp.exp(-h), approx=True)
        o_ref[...] = h.astype(o_ref.dtype)

    if not ktiled:
        finalize(jnp.dot(adj_ref[...], s_ref[...],
                         preferred_element_type=jnp.float32))
    else:
        k = pl.program_id(1)

        @pl.when(k == 0)
        def _():
            acc_ref[...] = jnp.zeros_like(acc_ref)

        acc_ref[...] += jnp.dot(adj_ref[...], s_ref[...],
                                preferred_element_type=jnp.float32)

        @pl.when(k == pl.num_programs(1) - 1)
        def _():
            finalize(acc_ref[...])


def _aggregate(adj_p, s_p, w_p, b_p, *, activation, out_dtype,
               tile_n, tile_k, resident, vmem_limit):
    """adj_p: [N_p, N_p] bf16, s_p: [N_p, f_s] bf16,
    optional w_p: [f_s, f_out_p] bf16 (fused epilogue matmul),
    b_p: [1, f_out_p] f32 -> [N_p, f_out_p] out_dtype."""
    n_p = adj_p.shape[0]
    f_s = s_p.shape[1]
    has_w = w_p is not None
    f_out_p = w_p.shape[1] if has_w else f_s
    out_bytes = jnp.dtype(out_dtype).itemsize

    kernel = functools.partial(_agg_kernel, activation=activation,
                               has_w=has_w, ktiled=not resident)

    flops = 2 * n_p * n_p * f_s + (2 * n_p * f_s * f_out_p if has_w else 0)
    transcendentals = n_p * f_out_p if activation == "sigmoid" else 0

    if resident:
        grid = (n_p // tile_n,)
        in_specs = [
            pl.BlockSpec((tile_n, n_p), lambda i: (i, 0)),       # adj row strip
            pl.BlockSpec((n_p, f_s), lambda i: (0, 0)),          # support, resident
        ]
        if has_w:
            in_specs.append(pl.BlockSpec((f_s, f_out_p), lambda i: (0, 0)))
        in_specs.append(pl.BlockSpec((1, f_out_p), lambda i: (0, 0)))
        out_specs = pl.BlockSpec((tile_n, f_out_p), lambda i: (i, 0))
        scratch = []
        dims = ("parallel",)
        support_reads = 1
    else:
        grid = (n_p // tile_n, n_p // tile_k)
        in_specs = [
            pl.BlockSpec((tile_n, tile_k), lambda i, k: (i, k)),   # adj tile
            pl.BlockSpec((tile_k, f_s), lambda i, k: (k, 0)),      # support K tile
        ]
        if has_w:
            in_specs.append(pl.BlockSpec((f_s, f_out_p), lambda i, k: (0, 0)))
        in_specs.append(pl.BlockSpec((1, f_out_p), lambda i, k: (0, 0)))
        out_specs = pl.BlockSpec((tile_n, f_out_p), lambda i, k: (i, 0))
        scratch = [pltpu.VMEM((tile_n, f_s), jnp.float32)]
        dims = ("parallel", "arbitrary")
        support_reads = n_p // tile_n

    bytes_accessed = (n_p * n_p * 2 + support_reads * n_p * f_s * 2
                      + n_p * f_out_p * out_bytes
                      + (f_s * f_out_p * 2 if has_w else 0))

    args = (adj_p, s_p) + ((w_p,) if has_w else ()) + (b_p,)
    return pl.pallas_call(
        kernel,
        out_shape=jax.ShapeDtypeStruct((n_p, f_out_p), out_dtype),
        grid_spec=pltpu.PrefetchScalarGridSpec(
            num_scalar_prefetch=0,
            grid=grid,
            in_specs=in_specs,
            out_specs=out_specs,
            scratch_shapes=scratch,
        ),
        compiler_params=pltpu.CompilerParams(
            dimension_semantics=dims, vmem_limit_bytes=vmem_limit),
        cost_estimate=pl.CostEstimate(
            flops=int(flops), transcendentals=int(transcendentals),
            bytes_accessed=int(bytes_accessed)),
    )(*args)


# ----------------------------------------------------------------------------
# model
# ----------------------------------------------------------------------------
class GCNPallas:
    """JAX/Pallas port of the PyTorch GCN module (forward pass)."""

    def __init__(self, n_feat, n_classes, dropout, ch_list=None,
                 multilabel=False, key=None,
                 target_tile_n=512, target_tile_k=2048, target_tile_fk=2048,
                 resident_support_bytes=None):
        ch_list = list(ch_list) if ch_list is not None else [n_feat, 256, 128]
        self.multilabel = multilabel
        self.dropout = dropout  # stored but unused in forward (matches reference)
        self.n_classes = n_classes
        self.target_tile_n = target_tile_n
        self.target_tile_k = target_tile_k
        self.target_tile_fk = target_tile_fk
        self.resident_support_bytes = resident_support_bytes  # None = auto
        self._vmem_capacity = _vmem_capacity_bytes()

        key = key if key is not None else jax.random.PRNGKey(0)
        dims = ch_list + [n_classes]
        self.params = []
        for i in range(len(dims) - 1):
            key, kw, kb = jax.random.split(key, 3)
            fan_in, fan_out = dims[i], dims[i + 1]
            stdv = 1.0 / (fan_in ** 0.5)
            w = jax.random.uniform(kw, (fan_in, fan_out), jnp.float32, -stdv, stdv)
            bias = jax.random.uniform(kb, (1, fan_out), jnp.float32, -stdv, stdv)
            self.params.append((w, bias))

    def __call__(self, x, adj):
        n_nodes = x.shape[0]
        n_p, tile_n = _choose_row_tiling(n_nodes, self.target_tile_n)
        tile_k = _largest_tile_dividing(n_p, self.target_tile_k)

        cap = self._vmem_capacity
        vmem_limit = max(32 << 20, min(cap * 3 // 4, cap - (8 << 20)))
        resident_budget = (self.resident_support_bytes
                           if self.resident_support_bytes is not None
                           else cap // 4)

        # Pad + cast adjacency once (dominant O(N^2) HBM traffic; bf16 halves it).
        adj_p = _pad2(adj, n_p, n_p).astype(jnp.bfloat16)
        h = x  # row/column padding + bf16 cast handled per layer (no-op after layer 0)

        n_layers = len(self.params)
        for idx, (w, b) in enumerate(self.params):
            is_last = idx == n_layers - 1
            f_in, f_out = w.shape
            f_in_p = _round_up(f_in, 128)
            f_out_p = _round_up(f_out, 128)
            act = ("sigmoid" if self.multilabel else "none") if is_last else "relu"
            out_dtype = jnp.float32 if is_last else jnp.bfloat16

            w_bf = _pad2(w, f_in_p, f_out_p).astype(jnp.bfloat16)
            b_f32 = _pad2(b, 1, f_out_p).astype(jnp.float32)
            h_bf = _pad2(h, n_p, f_in_p).astype(jnp.bfloat16)

            # Classifier fusion: adj @ (h @ W) == (adj @ h) @ W, so when W is
            # tiny apply it inside the aggregation epilogue and skip the
            # separate support matmul (+ its HBM round trip).
            fuse_w = is_last and (f_in_p * f_out_p * 2 <= (2 << 20))
            if fuse_w:
                s_p, w_fused, f_s = h_bf, w_bf, f_in_p
            else:
                tile_fk = _largest_tile_dividing(f_in_p, self.target_tile_fk)
                s_p = _support_matmul(h_bf, w_bf, tile_m=tile_n,
                                      tile_fk=tile_fk, vmem_limit=vmem_limit)
                w_fused, f_s = None, f_out_p

            # Resident-support aggregation when everything fits VMEM (support
            # loaded once, stays on chip); K-tiled accumulator fallback
            # otherwise.  Counts worst-case double buffering on each block.
            support_bytes = n_p * f_s * 2
            resident_vmem = (2 * support_bytes
                             + 2 * tile_n * n_p * 2
                             + 2 * tile_n * f_out_p * jnp.dtype(out_dtype).itemsize
                             + (2 * f_in_p * f_out_p * 2 if fuse_w else 0))
            resident = (support_bytes <= resident_budget
                        and resident_vmem <= vmem_limit)

            h = _aggregate(adj_p, s_p, w_fused, b_f32,
                           activation=act, out_dtype=out_dtype,
                           tile_n=tile_n, tile_k=tile_k,
                           resident=resident, vmem_limit=vmem_limit)

        # Slice off node-row and class-lane padding.
        return h[:n_nodes, :self.n_classes]


# ----------------------------------------------------------------------------
# demo / self-test
# ----------------------------------------------------------------------------
def _make_graph(key, n, n_feat, p_edge=0.05):
    kx, ka = jax.random.split(key)
    x = jax.random.normal(kx, (n, n_feat), dtype=jnp.float32)
    a = (jax.random.uniform(ka, (n, n)) < p_edge).astype(jnp.float32)
    a = jnp.maximum(a, a.T) + jnp.eye(n, dtype=jnp.float32)
    adj = a / jnp.sum(a, axis=1, keepdims=True)
    return x, adj


def _reference(params, x, adj, multilabel):
    h = x
    for w, b in params[:-1]:
        h = jnp.maximum(adj @ (h @ w) + b, 0.0)
    w, b = params[-1]
    h = adj @ (h @ w) + b
    if multilabel:
        h = jax.nn.sigmoid(h)
    return h


if __name__ == "__main__":
    key = jax.random.PRNGKey(0)
    k1, k2, kp1, kp2 = jax.random.split(key, 4)

    # --- test 1: default config (exercises resident-support + fused classifier)
    N1, F1, C1 = 128, 64, 8
    x1, adj1 = _make_graph(k1, N1, F1)
    model1 = GCNPallas(n_feat=F1, n_classes=C1, dropout=0.5,
                       multilabel=False, key=kp1)
    out1 = jax.block_until_ready(jax.jit(model1.__call__)(x1, adj1))
    ref1 = _reference(model1.params, x1, adj1, multilabel=False)
    assert out1.shape == (N1, C1), out1.shape
    assert jnp.all(jnp.isfinite(out1))
    assert float(jnp.max(jnp.abs(out1 - ref1))) < 1e-1  # bf16-MXU tolerance

    # --- test 2: forced K-tiled fallback, multi-step f_in tiling, sigmoid head
    N2, F2, C2 = 256, 320, 5
    x2, adj2 = _make_graph(k2, N2, F2)
    model2 = GCNPallas(n_feat=F2, n_classes=C2, dropout=0.3,
                       multilabel=True, key=kp2,
                       target_tile_n=128, target_tile_k=128, target_tile_fk=128,
                       resident_support_bytes=0)  # force the K-tiled path
    out2 = jax.block_until_ready(jax.jit(model2.__call__)(x2, adj2))
    ref2 = _reference(model2.params, x2, adj2, multilabel=True)
    assert out2.shape == (N2, C2), out2.shape
    assert jnp.all(jnp.isfinite(out2))
    assert float(jnp.max(jnp.abs(out2 - ref2))) < 5e-2

    print("KERNEL_OK")
</pallas_src>

<mosaic_0001>
module attributes {stable_mosaic.version = 11 : i64} {
  func.func @_agg_kernel(%arg0: i32, %arg1: memref<64x128xbf16, #tpu.memory_space<vmem>>, %arg2: memref<128x256xbf16, #tpu.memory_space<vmem>>, %arg3: memref<1x256xf32, #tpu.memory_space<vmem>>, %arg4: memref<64x256xbf16, #tpu.memory_space<vmem>>) attributes {dimension_semantics = [#tpu.dimension_semantics<parallel>], iteration_bounds = array<i64: 2>, scalar_prefetch = 0 : i64, scratch_operands = 0 : i64, tpu.core_type = #tpu.core_type<tc>, window_params = [{transform_indices = @transform_0, window_bounds = array<i64: 64, 128>}, {pipeline_mode = #tpu.pipeline_mode<synchronous>, transform_indices = @transform_1, window_bounds = array<i64: 128, 256>}, {pipeline_mode = #tpu.pipeline_mode<synchronous>, transform_indices = @transform_2, window_bounds = array<i64: 1, 256>}, {transform_indices = @transform_3, window_bounds = array<i64: 64, 256>}]} {
    %c0 = arith.constant 0 : index
    %c0_0 = arith.constant 0 : index
    %0 = vector.load %arg1[%c0, %c0_0] : memref<64x128xbf16, #tpu.memory_space<vmem>>, vector<64x128xbf16>
    %c0_1 = arith.constant 0 : index
    %c0_2 = arith.constant 0 : index
    %1 = vector.load %arg2[%c0_1, %c0_2] : memref<128x256xbf16, #tpu.memory_space<vmem>>, vector<128x256xbf16>
    %cst = arith.constant dense<0.000000e+00> : vector<64x256xf32>
    %2 = tpu.matmul %0, %1, %cst {dimension_numbers = #tpu.dot_dimension_numbers<[1], [0], [0], [1], [0, 0, 1, 1], [], []>} : vector<64x128xbf16>, vector<128x256xbf16>, vector<64x256xf32> -> vector<64x256xf32>
    %c0_3 = arith.constant 0 : index
    %c0_4 = arith.constant 0 : index
    %3 = vector.load %arg3[%c0_3, %c0_4] : memref<1x256xf32, #tpu.memory_space<vmem>>, vector<1x256xf32>
    %4 = vector.broadcast %3 : vector<1x256xf32> to vector<64x256xf32>
    %5 = arith.addf %2, %4 : vector<64x256xf32>
    %cst_5 = arith.constant 0.000000e+00 : f32
    %6 = vector.broadcast %cst_5 : f32 to vector<64x256xf32>
    %7 = arith.maximumf %5, %6 : vector<64x256xf32>
    %8 = arith.truncf %7 : vector<64x256xf32> to vector<64x256xbf16>
    %c0_6 = arith.constant 0 : index
    %c0_7 = arith.constant 0 : index
    %9 = vector.load %arg4[%c0_6, %c0_7] : memref<64x256xbf16, #tpu.memory_space<vmem>>, vector<64x256xbf16>
    tpu.vector_store %arg4[%c0_6, %c0_7], %8 {strides = array<i32>} : memref<64x256xbf16, #tpu.memory_space<vmem>>, vector<64x256xbf16>,
    return
  }
  func.func @transform_0(%arg0: i32) -> (i32, i32) {
    %c0_i32 = arith.constant 0 : i32
    %c0_i32_0 = arith.constant 0 : i32
    return %arg0, %c0_i32 : i32, i32
  }
  func.func @transform_1(%arg0: i32) -> (i32, i32) {
    %c0_i32 = arith.constant 0 : i32
    %c0_i32_0 = arith.constant 0 : i32
    %c0_i32_1 = arith.constant 0 : i32
    return %c0_i32, %c0_i32_0 : i32, i32
  }
  func.func @transform_2(%arg0: i32) -> (i32, i32) {
    %c0_i32 = arith.constant 0 : i32
    %c0_i32_0 = arith.constant 0 : i32
    %c0_i32_1 = arith.constant 0 : i32
    return %c0_i32, %c0_i32_0 : i32, i32
  }
  func.func @transform_3(%arg0: i32) -> (i32, i32) {
    %c0_i32 = arith.constant 0 : i32
    %c0_i32_0 = arith.constant 0 : i32
    return %arg0, %c0_i32 : i32, i32
  }
}

module attributes {stable_mosaic.version = 11 : i64} {
  func.func @_xw_kernel(%arg0: i32, %arg1: i32, %arg2: memref<64x128xbf16, #tpu.memory_space<vmem>>, %arg3: memref<128x256xbf16, #tpu.memory_space<vmem>>, %arg4: memref<64x256xbf16, #tpu.memory_space<vmem>>, %arg5: memref<64x256xf32, #tpu.memory_space<vmem>>) attributes {dimension_semantics = [#tpu.dimension_semantics<parallel>, #tpu.dimension_semantics<arbitrary>], iteration_bounds = array<i64: 2, 1>, scalar_prefetch = 0 : i64, scratch_operands = 1 : i64, tpu.core_type = #tpu.core_type<tc>, window_params = [{transform_indices = @transform_0, window_bounds = array<i64: 64, 128>}, {transform_indices = @transform_1, window_bounds = array<i64: 128, 256>}, {transform_indices = @transform_2, window_bounds = array<i64: 64, 256>}]} {
    %c0_i32 = arith.constant 0 : i32
    %0 = arith.cmpi eq, %arg1, %c0_i32 : i32
    %1 = arith.extui %0 : i1 to i32
    %c0_i32_0 = arith.constant 0 : i32
    %2 = arith.cmpi ne, %1, %c0_i32_0 : i32
    scf.if %2 {
      %cst_10 = arith.constant 0.000000e+00 : f32
      %12 = vector.broadcast %cst_10 : f32 to vector<64x256xf32>
      %c0_11 = arith.constant 0 : index
      %c0_12 = arith.constant 0 : index
      %13 = vector.load %arg5[%c0_11, %c0_12] : memref<64x256xf32, #tpu.memory_space<vmem>>, vector<64x256xf32>
      tpu.vector_store %arg5[%c0_11, %c0_12], %12 {strides = array<i32>} : memref<64x256xf32, #tpu.memory_space<vmem>>, vector<64x256xf32>,
    } else {
    }
    %c0 = arith.constant 0 : index
    %c0_1 = arith.constant 0 : index
    %3 = vector.load %arg5[%c0, %c0_1] : memref<64x256xf32, #tpu.memory_space<vmem>>, vector<64x256xf32>
    %c0_2 = arith.constant 0 : index
    %c0_3 = arith.constant 0 : index
    %4 = vector.load %arg2[%c0_2, %c0_3] : memref<64x128xbf16, #tpu.memory_space<vmem>>, vector<64x128xbf16>
    %c0_4 = arith.constant 0 : index
    %c0_5 = arith.constant 0 : index
    %5 = vector.load %arg3[%c0_4, %c0_5] : memref<128x256xbf16, #tpu.memory_space<vmem>>, vector<128x256xbf16>
    %cst = arith.constant dense<0.000000e+00> : vector<64x256xf32>
    %6 = tpu.matmul %4, %5, %cst {dimension_numbers = #tpu.dot_dimension_numbers<[1], [0], [0], [1], [0, 0, 1, 1], [], []>} : vector<64x128xbf16>, vector<128x256xbf16>, vector<64x256xf32> -> vector<64x256xf32>
    %7 = arith.addf %3, %6 : vector<64x256xf32>
    %c0_6 = arith.constant 0 : index
    %c0_7 = arith.constant 0 : index
    %8 = vector.load %arg5[%c0_6, %c0_7] : memref<64x256xf32, #tpu.memory_space<vmem>>, vector<64x256xf32>
    tpu.vector_store %arg5[%c0_6, %c0_7], %7 {strides = array<i32>} : memref<64x256xf32, #tpu.memory_space<vmem>>, vector<64x256xf32>,
    %c0_i32_8 = arith.constant 0 : i32
    %9 = arith.cmpi eq, %arg1, %c0_i32_8 : i32
    %10 = arith.extui %9 : i1 to i32
    %c0_i32_9 = arith.constant 0 : i32
    %11 = arith.cmpi ne, %10, %c0_i32_9 : i32
    scf.if %11 {
      %c0_10 = arith.constant 0 : index
      %c0_11 = arith.constant 0 : index
      %12 = vector.load %arg5[%c0_10, %c0_11] : memref<64x256xf32, #tpu.memory_space<vmem>>, vector<64x256xf32>
      %13 = arith.truncf %12 : vector<64x256xf32> to vector<64x256xbf16>
      %c0_12 = arith.constant 0 : index
      %c0_13 = arith.constant 0 : index
      %14 = vector.load %arg4[%c0_12, %c0_13] : memref<64x256xbf16, #tpu.memory_space<vmem>>, vector<64x256xbf16>
      tpu.vector_store %arg4[%c0_12, %c0_13], %13 {strides = array<i32>} : memref<64x256xbf16, #tpu.memory_space<vmem>>, vector<64x256xbf16>,
    } else {
    }
    return
  }
  func.func @transform_0(%arg0: i32, %arg1: i32) -> (i32, i32) {
    %c0_i32 = arith.constant 0 : i32
    return %arg0, %arg1 : i32, i32
  }
  func.func @transform_1(%arg0: i32, %arg1: i32) -> (i32, i32) {
    %c0_i32 = arith.constant 0 : i32
    %c0_i32_0 = arith.constant 0 : i32
    return %arg1, %c0_i32 : i32, i32
  }
  func.func @transform_2(%arg0: i32, %arg1: i32) -> (i32, i32) {
    %c0_i32 = arith.constant 0 : i32
    %c0_i32_0 = arith.constant 0 : i32
    return %arg0, %c0_i32 : i32, i32
  }
}

module attributes {stable_mosaic.version = 11 : i64} {
  func.func @_xw_kernel(%arg0: i32, %arg1: i32, %arg2: memref<64x256xbf16, #tpu.memory_space<vmem>>, %arg3: memref<256x128xbf16, #tpu.memory_space<vmem>>, %arg4: memref<64x128xbf16, #tpu.memory_space<vmem>>, %arg5: memref<64x128xf32, #tpu.memory_space<vmem>>) attributes {dimension_semantics = [#tpu.dimension_semantics<parallel>, #tpu.dimension_semantics<arbitrary>], iteration_bounds = array<i64: 2, 1>, scalar_prefetch = 0 : i64, scratch_operands = 1 : i64, tpu.core_type = #tpu.core_type<tc>, window_params = [{transform_indices = @transform_0, window_bounds = array<i64: 64, 256>}, {transform_indices = @transform_1, window_bounds = array<i64: 256, 128>}, {transform_indices = @transform_2, window_bounds = array<i64: 64, 128>}]} {
    %c0_i32 = arith.constant 0 : i32
    %0 = arith.cmpi eq, %arg1, %c0_i32 : i32
    %1 = arith.extui %0 : i1 to i32
    %c0_i32_0 = arith.constant 0 : i32
    %2 = arith.cmpi ne, %1, %c0_i32_0 : i32
    scf.if %2 {
      %cst_10 = arith.constant 0.000000e+00 : f32
      %12 = vector.broadcast %cst_10 : f32 to vector<64x128xf32>
      %c0_11 = arith.constant 0 : index
      %c0_12 = arith.constant 0 : index
      %13 = vector.load %arg5[%c0_11, %c0_12] : memref<64x128xf32, #tpu.memory_space<vmem>>, vector<64x128xf32>
      tpu.vector_store %arg5[%c0_11, %c0_12], %12 {strides = array<i32>} : memref<64x128xf32, #tpu.memory_space<vmem>>, vector<64x128xf32>,
    } else {
    }
    %c0 = arith.constant 0 : index
    %c0_1 = arith.constant 0 : index
    %3 = vector.load %arg5[%c0, %c0_1] : memref<64x128xf32, #tpu.memory_space<vmem>>, vector<64x128xf32>
    %c0_2 = arith.constant 0 : index
    %c0_3 = arith.constant 0 : index
    %4 = vector.load %arg2[%c0_2, %c0_3] : memref<64x256xbf16, #tpu.memory_space<vmem>>, vector<64x256xbf16>
    %c0_4 = arith.constant 0 : index
    %c0_5 = arith.constant 0 : index
    %5 = vector.load %arg3[%c0_4, %c0_5] : memref<256x128xbf16, #tpu.memory_space<vmem>>, vector<256x128xbf16>
    %cst = arith.constant dense<0.000000e+00> : vector<64x128xf32>
    %6 = tpu.matmul %4, %5, %cst {dimension_numbers = #tpu.dot_dimension_numbers<[1], [0], [0], [1], [0, 0, 1, 1], [], []>} : vector<64x256xbf16>, vector<256x128xbf16>, vector<64x128xf32> -> vector<64x128xf32>
    %7 = arith.addf %3, %6 : vector<64x128xf32>
    %c0_6 = arith.constant 0 : index
    %c0_7 = arith.constant 0 : index
    %8 = vector.load %arg5[%c0_6, %c0_7] : memref<64x128xf32, #tpu.memory_space<vmem>>, vector<64x128xf32>
    tpu.vector_store %arg5[%c0_6, %c0_7], %7 {strides = array<i32>} : memref<64x128xf32, #tpu.memory_space<vmem>>, vector<64x128xf32>,
    %c0_i32_8 = arith.constant 0 : i32
    %9 = arith.cmpi eq, %arg1, %c0_i32_8 : i32
    %10 = arith.extui %9 : i1 to i32
    %c0_i32_9 = arith.constant 0 : i32
    %11 = arith.cmpi ne, %10, %c0_i32_9 : i32
    scf.if %11 {
      %c0_10 = arith.constant 0 : index
      %c0_11 = arith.constant 0 : index
      %12 = vector.load %arg5[%c0_10, %c0_11] : memref<64x128xf32, #tpu.memory_space<vmem>>, vector<64x128xf32>
      %13 = arith.truncf %12 : vector<64x128xf32> to vector<64x128xbf16>
      %c0_12 = arith.constant 0 : index
      %c0_13 = arith.constant 0 : index
      %14 = vector.load %arg4[%c0_12, %c0_13] : memref<64x128xbf16, #tpu.memory_space<vmem>>, vector<64x128xbf16>
      tpu.vector_store %arg4[%c0_12, %c0_13], %13 {strides = array<i32>} : memref<64x128xbf16, #tpu.memory_space<vmem>>, vector<64x128xbf16>,
    } else {
    }
    return
  }
  func.func @transform_0(%arg0: i32, %arg1: i32) -> (i32, i32) {
    %c0_i32 = arith.constant 0 : i32
    return %arg0, %arg1 : i32, i32
  }
  func.func @transform_1(%arg0: i32, %arg1: i32) -> (i32, i32) {
    %c0_i32 = arith.constant 0 : i32
    %c0_i32_0 = arith.constant 0 : i32
    return %arg1, %c0_i32 : i32, i32
  }
  func.func @transform_2(%arg0: i32, %arg1: i32) -> (i32, i32) {
    %c0_i32 = arith.constant 0 : i32
    %c0_i32_0 = arith.constant 0 : i32
    return %arg0, %c0_i32 : i32, i32
  }
}

module attributes {stable_mosaic.version = 11 : i64} {
  func.func @_agg_kernel(%arg0: i32, %arg1: memref<64x128xbf16, #tpu.memory_space<vmem>>, %arg2: memref<128x128xbf16, #tpu.memory_space<vmem>>, %arg3: memref<1x128xf32, #tpu.memory_space<vmem>>, %arg4: memref<64x128xbf16, #tpu.memory_space<vmem>>) attributes {dimension_semantics = [#tpu.dimension_semantics<parallel>], iteration_bounds = array<i64: 2>, scalar_prefetch = 0 : i64, scratch_operands = 0 : i64, tpu.core_type = #tpu.core_type<tc>, window_params = [{transform_indices = @transform_0, window_bounds = array<i64: 64, 128>}, {pipeline_mode = #tpu.pipeline_mode<synchronous>, transform_indices = @transform_1, window_bounds = array<i64: 128, 128>}, {pipeline_mode = #tpu.pipeline_mode<synchronous>, transform_indices = @transform_2, window_bounds = array<i64: 1, 128>}, {transform_indices = @transform_3, window_bounds = array<i64: 64, 128>}]} {
    %c0 = arith.constant 0 : index
    %c0_0 = arith.constant 0 : index
    %0 = vector.load %arg1[%c0, %c0_0] : memref<64x128xbf16, #tpu.memory_space<vmem>>, vector<64x128xbf16>
    %c0_1 = arith.constant 0 : index
    %c0_2 = arith.constant 0 : index
    %1 = vector.load %arg2[%c0_1, %c0_2] : memref<128x128xbf16, #tpu.memory_space<vmem>>, vector<128x128xbf16>
    %cst = arith.constant dense<0.000000e+00> : vector<64x128xf32>
    %2 = tpu.matmul %0, %1, %cst {dimension_numbers = #tpu.dot_dimension_numbers<[1], [0], [0], [1], [0, 0, 1, 1], [], []>} : vector<64x128xbf16>, vector<128x128xbf16>, vector<64x128xf32> -> vector<64x128xf32>
    %c0_3 = arith.constant 0 : index
    %c0_4 = arith.constant 0 : index
    %3 = vector.load %arg3[%c0_3, %c0_4] : memref<1x128xf32, #tpu.memory_space<vmem>>, vector<1x128xf32>
    %4 = vector.broadcast %3 : vector<1x128xf32> to vector<64x128xf32>
    %5 = arith.addf %2, %4 : vector<64x128xf32>
    %cst_5 = arith.constant 0.000000e+00 : f32
    %6 = vector.broadcast %cst_5 : f32 to vector<64x128xf32>
    %7 = arith.maximumf %5, %6 : vector<64x128xf32>
    %8 = arith.truncf %7 : vector<64x128xf32> to vector<64x128xbf16>
    %c0_6 = arith.constant 0 : index
    %c0_7 = arith.constant 0 : index
    %9 = vector.load %arg4[%c0_6, %c0_7] : memref<64x128xbf16, #tpu.memory_space<vmem>>, vector<64x128xbf16>
    tpu.vector_store %arg4[%c0_6, %c0_7], %8 {strides = array<i32>} : memref<64x128xbf16, #tpu.memory_space<vmem>>, vector<64x128xbf16>,
    return
  }
  func.func @transform_0(%arg0: i32) -> (i32, i32) {
    %c0_i32 = arith.constant 0 : i32
    %c0_i32_0 = arith.constant 0 : i32
    return %arg0, %c0_i32 : i32, i32
  }
  func.func @transform_1(%arg0: i32) -> (i32, i32) {
    %c0_i32 = arith.constant 0 : i32
    %c0_i32_0 = arith.constant 0 : i32
    %c0_i32_1 = arith.constant 0 : i32
    return %c0_i32, %c0_i32_0 : i32, i32
  }
  func.func @transform_2(%arg0: i32) -> (i32, i32) {
    %c0_i32 = arith.constant 0 : i32
    %c0_i32_0 = arith.constant 0 : i32
    %c0_i32_1 = arith.constant 0 : i32
    return %c0_i32, %c0_i32_0 : i32, i32
  }
  func.func @transform_3(%arg0: i32) -> (i32, i32) {
    %c0_i32 = arith.constant 0 : i32
    %c0_i32_0 = arith.constant 0 : i32
    return %arg0, %c0_i32 : i32, i32
  }
}

module attributes {stable_mosaic.version = 11 : i64} {
  func.func @_agg_kernel(%arg0: i32, %arg1: memref<64x128xbf16, #tpu.memory_space<vmem>>, %arg2: memref<128x128xbf16, #tpu.memory_space<vmem>>, %arg3: memref<128x128xbf16, #tpu.memory_space<vmem>>, %arg4: memref<1x128xf32, #tpu.memory_space<vmem>>, %arg5: memref<64x128xf32, #tpu.memory_space<vmem>>) attributes {dimension_semantics = [#tpu.dimension_semantics<parallel>], iteration_bounds = array<i64: 2>, scalar_prefetch = 0 : i64, scratch_operands = 0 : i64, tpu.core_type = #tpu.core_type<tc>, window_params = [{transform_indices = @transform_0, window_bounds = array<i64: 64, 128>}, {pipeline_mode = #tpu.pipeline_mode<synchronous>, transform_indices = @transform_1, window_bounds = array<i64: 128, 128>}, {pipeline_mode = #tpu.pipeline_mode<synchronous>, transform_indices = @transform_2, window_bounds = array<i64: 128, 128>}, {pipeline_mode = #tpu.pipeline_mode<synchronous>, transform_indices = @transform_3, window_bounds = array<i64: 1, 128>}, {transform_indices = @transform_4, window_bounds = array<i64: 64, 128>}]} {
    %c0 = arith.constant 0 : index
    %c0_0 = arith.constant 0 : index
    %0 = vector.load %arg1[%c0, %c0_0] : memref<64x128xbf16, #tpu.memory_space<vmem>>, vector<64x128xbf16>
    %c0_1 = arith.constant 0 : index
    %c0_2 = arith.constant 0 : index
    %1 = vector.load %arg2[%c0_1, %c0_2] : memref<128x128xbf16, #tpu.memory_space<vmem>>, vector<128x128xbf16>
    %cst = arith.constant dense<0.000000e+00> : vector<64x128xf32>
    %2 = tpu.matmul %0, %1, %cst {dimension_numbers = #tpu.dot_dimension_numbers<[1], [0], [0], [1], [0, 0, 1, 1], [], []>} : vector<64x128xbf16>, vector<128x128xbf16>, vector<64x128xf32> -> vector<64x128xf32>
    %3 = arith.truncf %2 : vector<64x128xf32> to vector<64x128xbf16>
    %c0_3 = arith.constant 0 : index
    %c0_4 = arith.constant 0 : index
    %4 = vector.load %arg3[%c0_3, %c0_4] : memref<128x128xbf16, #tpu.memory_space<vmem>>, vector<128x128xbf16>
    %cst_5 = arith.constant dense<0.000000e+00> : vector<64x128xf32>
    %5 = tpu.matmul %3, %4, %cst_5 {dimension_numbers = #tpu.dot_dimension_numbers<[1], [0], [0], [1], [0, 0, 1, 1], [], []>} : vector<64x128xbf16>, vector<128x128xbf16>, vector<64x128xf32> -> vector<64x128xf32>
    %c0_6 = arith.constant 0 : index
    %c0_7 = arith.constant 0 : index
    %6 = vector.load %arg4[%c0_6, %c0_7] : memref<1x128xf32, #tpu.memory_space<vmem>>, vector<1x128xf32>
    %7 = vector.broadcast %6 : vector<1x128xf32> to vector<64x128xf32>
    %8 = arith.addf %5, %7 : vector<64x128xf32>
    %c0_8 = arith.constant 0 : index
    %c0_9 = arith.constant 0 : index
    %9 = vector.load %arg5[%c0_8, %c0_9] : memref<64x128xf32, #tpu.memory_space<vmem>>, vector<64x128xf32>
    tpu.vector_store %arg5[%c0_8, %c0_9], %8 {strides = array<i32>} : memref<64x128xf32, #tpu.memory_space<vmem>>, vector<64x128xf32>,
    return
  }
  func.func @transform_0(%arg0: i32) -> (i32, i32) {
    %c0_i32 = arith.constant 0 : i32
    %c0_i32_0 = arith.constant 0 : i32
    return %arg0, %c0_i32 : i32, i32
  }
  func.func @transform_1(%arg0: i32) -> (i32, i32) {
    %c0_i32 = arith.constant 0 : i32
    %c0_i32_0 = arith.constant 0 : i32
    %c0_i32_1 = arith.constant 0 : i32
    return %c0_i32, %c0_i32_0 : i32, i32
  }
  func.func @transform_2(%arg0: i32) -> (i32, i32) {
    %c0_i32 = arith.constant 0 : i32
    %c0_i32_0 = arith.constant 0 : i32
    %c0_i32_1 = arith.constant 0 : i32
    return %c0_i32, %c0_i32_0 : i32, i32
  }
  func.func @transform_3(%arg0: i32) -> (i32, i32) {
    %c0_i32 = arith.constant 0 : i32
    %c0_i32_0 = arith.constant 0 : i32
    %c0_i32_1 = arith.constant 0 : i32
    return %c0_i32, %c0_i32_0 : i32, i32
  }
  func.func @transform_4(%arg0: i32) -> (i32, i32) {
    %c0_i32 = arith.constant 0 : i32
    %c0_i32_0 = arith.constant 0 : i32
    return %arg0, %c0_i32 : i32, i32
  }
}

</mosaic_0001>

<bundles_post_ra>
// kernel: a_call__.6
= control target key start
LH: loop header
LB: loop body
LE: loop exit
PB: predicated region body
PF: predicated region fallthrough
CT: control target
= control target key end

     0   :  { %s651_s12 = smov 0   ;;  %s739_s0 = inlined_call_operand.vmem [shape: bf16[128,128], index: 0, kind: input, shape index: {}]   ;;  %s740_s1 = inlined_call_operand.vmem [shape: bf16[128,256], index: 1, kind: input, shape index: {}]   ;;  %s741_s2 = inlined_call_operand.vmem [shape: f32[1,256], index: 2, kind: input, shape index: {}]   ;;  %s742_s3 = inlined_call_operand.vmem [shape: bf16[128,256], index: 3, kind: output, shape index: {}]  }
   0x1 LB: > { %s520_s13 = sadd.s32 4294967295, %s628_s12   ;;  %p524_p0 = scmp.ge.s32.totalorder %s628_s12, 1  ;;  %s628_s12 = sphi %s651_s12, %s13_s12  }
   0x2   : > { %p138_p1 = scmp.lt.s32.totalorder %s628_s12, 3 }
   0x4   : > { %p139_p2 = pnand %p524_p0, %p138_p1 }
   0x5   : > { %v594_v0 = vld [vmem:[%s740_s1 + $0x4] ss:$8 sps:$4 sm:$0xff] (!%p139_p2)   ;;  %s525_s16 = sshll.u32 (!%p139_p2), %s520_s13, 3  ;;  %v596_v1 = vld [vmem:[%s740_s1] ss:$8 sps:$4 sm:$0xff] (!%p139_p2)   ;;  %v630_v2 = vmov (!%p139_p2), 0   ;;  %v203_v21 = vlaneseq (!%p139_p2) }
   0x6   : > { %142 = sbr.rel (%p139_p2) target bundleno = 269 (0x10d), region = 32  ;;  %349 = vmatprep.mubr.bf16.mxu0 (!%p139_p2), %v630_v2  ;;  %369 = vmatprep.mubr.bf16.mxu1 (!%p139_p2), %v630_v2  ;;  %p164_p3 = scmp.lt.s32.totalorder (!%p139_p2), %s525_s16, 15  ;;  %v597_v3 = vld [vmem:[%s740_s1 + $0x14] ss:$8 sps:$4 sm:$0xff] (!%p139_p2)   ;;  %v599_v4 = vld [vmem:[%s740_s1 + $0x10] ss:$8 sps:$4 sm:$0xff] (!%p139_p2)  }
   0x7   : > { %317 = vmatprep.subr.bf16.mxu0 (!%p139_p2), %v594_v0  ;;  %569 = vmatprep.subr.bf16.mxu1 (!%p139_p2), %v594_v0  ;;  %v600_v5 = vld [vmem:[%s740_s1 + $0x24] ss:$8 sps:$4 sm:$0xff] (!%p139_p2)   ;;  %v602_v6 = vld [vmem:[%s740_s1 + $0x20] ss:$8 sps:$4 sm:$0xff] (!%p139_p2)   ;;  %v603_v7 = vld [vmem:[%s740_s1 + $0x34] ss:$8 sps:$4 sm:$0xff] (!%p139_p2)  }
   0x8   : > { %318 = vmatpush1.bf16.msra.mxu0 (!%p139_p2), %v596_v1  ;;  %577 = vmatpush1.bf16.msra.mxu1 (!%p139_p2), %v596_v1  ;;  %v605_v8 = vld [vmem:[%s740_s1 + $0x30] ss:$8 sps:$4 sm:$0xff] (!%p139_p2)   ;;  %v606_v9 = vld [vmem:[%s740_s1 + $0x44] ss:$8 sps:$4 sm:$0xff] (!%p139_p2)   ;;  %v608_v10 = vld [vmem:[%s740_s1 + $0x40] ss:$8 sps:$4 sm:$0xff] (!%p139_p2)  }
   0x9   : > { %319 = vmatprep.subr.bf16.mxu0 (!%p139_p2), %v597_v3  ;;  %570 = vmatprep.subr.bf16.mxu1 (!%p139_p2), %v597_v3  ;;  %v609_v11 = vld [vmem:[%s740_s1 + $0x54] ss:$8 sps:$4 sm:$0xff] (!%p139_p2)   ;;  %v611_v12 = vld [vmem:[%s740_s1 + $0x50] ss:$8 sps:$4 sm:$0xff] (!%p139_p2)   ;;  %v612_v13 = vld [vmem:[%s740_s1 + $0x64] ss:$8 sps:$4 sm:$0xff] (!%p139_p2)  }
   0xa   : > { %v614_v14 = vld [vmem:[%s740_s1 + $0x60] ss:$8 sps:$4 sm:$0xff] (!%p139_p2)   ;;  %v615_v15 = vld [vmem:[%s740_s1 + $0x74] ss:$8 sps:$4 sm:$0xff] (!%p139_p2)   ;;  %v617_v16 = vld [vmem:[%s740_s1 + $0x70] ss:$8 sps:$4 sm:$0xff] (!%p139_p2)  }
   0xb   : > { %v204_v22 = vshrl.u32 (!%p139_p2), %v203_v21, 7  ;;  %v201_v24 = vld [vmem:[%s741_s2] sm:$0x3] (!%p139_p2) }
   0xc   : > { %320 = vmatpush1.bf16.msra.mxu0 (!%p139_p2), %v599_v4  ;;  %578 = vmatpush1.bf16.msra.mxu1 (!%p139_p2), %v599_v4 }
   0xd   : > { %s744_s16 = smov (!%p164_p3, %s525_s16), 15  ;;  %321 = vmatprep.subr.bf16.mxu0 %v600_v5  ;;  %571 = vmatprep.subr.bf16.mxu1 %v600_v5  ;;  %v205_v23 = vsub.s32 0, %v204_v22  ;;  %v209_v25 = vsub.s32 1, %v204_v22 }
   0xe   : > { %s526_s25 = sshll.u32 %s744_s16, 2  ;;  %s560_s28 = sshll.u32 %s744_s16, 3 }
   0xf   : > { %s686_s5 = scalar_lea.vmem %s739_s0, %s526_s25  ;;  %v206_v26 = vrot.slane %v201_v24, %v205_v23  ;;  %v210_v27 = vrot.slane %v201_v24, %v209_v25  ;;  %s726_s4 = scalar_lea.vmem %s742_s3, %s560_s28 }
  0x10   : > { %322 = vmatpush1.bf16.msra.mxu0 %v602_v6  ;;  %579 = vmatpush1.bf16.msra.mxu1 %v602_v6  ;;  %v618_v17 = vld [vmem:[%s686_s5] sm:$0xff]   ;;  %v619_v18 = vld [vmem:[%s686_s5 + $0x10] sm:$0xff]   ;;  %v620_v19 = vld [vmem:[%s686_s5 + $0x8] sm:$0xff]  }
  0x11   : > { %323 = vmatprep.subr.bf16.mxu0 %v603_v7  ;;  %572 = vmatprep.subr.bf16.mxu1 %v603_v7  ;;  %v621_v20 = vld [vmem:[%s686_s5 + $0x18] sm:$0xff]  }
  0x14   : > { %324 = vmatpush1.bf16.msra.mxu0 %v605_v8  ;;  %580 = vmatpush1.bf16.msra.mxu1 %v605_v8 }
  0x15   : > { %325 = vmatprep.subr.bf16.mxu0 %v606_v9  ;;  %573 = vmatprep.subr.bf16.mxu1 %v606_v9 }
  0x18   : > { %326 = vmatpush1.bf16.msra.mxu0 %v608_v10  ;;  %581 = vmatpush1.bf16.msra.mxu1 %v608_v10 }
  0x19   : > { %327 = vmatprep.subr.bf16.mxu0 %v609_v11  ;;  %574 = vmatprep.subr.bf16.mxu1 %v609_v11 }
  0x1c   : > { %328 = vmatpush1.bf16.msra.mxu0 %v611_v12  ;;  %582 = vmatpush1.bf16.msra.mxu1 %v611_v12 }
  0x1d   : > { %329 = vmatprep.subr.bf16.mxu0 %v612_v13  ;;  %575 = vmatprep.subr.bf16.mxu1 %v612_v13 }
  0x20   : > { %330 = vmatpush1.bf16.msra.mxu0 %v614_v14  ;;  %583 = vmatpush1.bf16.msra.mxu1 %v614_v14 }
  0x21   : > { %331 = vmatprep.subr.bf16.mxu0 %v615_v15  ;;  %576 = vmatprep.subr.bf16.mxu1 %v615_v15 }
  0x24   : > { %332 = vmatpush1.bf16.msra.mxu0 %v617_v16  ;;  %584 = vmatpush1.bf16.msra.mxu1 %v617_v16 }
  0x27   : > { %350 = vmatmul.mubr.bf16.vlgmr.msra.gmra.mrb[0].mxu0 %v618_v17  ;;  %370 = vmatmul.mubr.bf16.vlgmr.msra.gmra.mrb[0].mxu1 %v619_v18 }
  0x28   : > { %359 = vmatprep.mubr.bf16.mxu0 %v630_v2  ;;  %379 = vmatprep.mubr.bf16.mxu1 %v630_v2 }
  0x2f   : > { %360 = vmatmul.mubr.bf16.gmra.mrb[4].mxu0 %v620_v19  ;;  %380 = vmatmul.mubr.bf16.gmra.mrb[4].mxu1 %v621_v20 }
  0xfa   : > { %v351_v28 = vpop.f32.mrb[0].mxu0  ;;  %v371_v29 = vpop.f32.mrb[0].mxu1 }
  0xfb   : > { %v352_v30 = vadd.f32 %v351_v28, %v206_v26  ;;  %v372_v31 = vadd.f32 %v371_v29, %v206_v26  ;;  %v353_v32 = vpop.f32.mrb[1].mxu0  ;;  %v373_v33 = vpop.f32.mrb[1].mxu1 }
  0xfc   : > { %v354_v34 = vadd.f32 %v353_v32, %v210_v27  ;;  %v374_v35 = vadd.f32 %v373_v33, %v210_v27  ;;  %v355_v36 = vpop.f32.mrb[2].mxu0  ;;  %v375_v37 = vpop.f32.mrb[2].mxu1 }
  0xfd   : > { %v390_v38 = vmax.f32 %v352_v30, 0.0  ;;  %v398_v39 = vmax.f32 %v372_v31, 0.0  ;;  %v356_v40 = vadd.f32 %v355_v36, %v206_v26  ;;  %v376_v41 = vadd.f32 %v375_v37, %v206_v26  ;;  %v357_v42 = vpop.f32.mrb[3].mxu0  ;;  %v377_v43 = vpop.f32.mrb[3].mxu1 }
  0xfe   : > { %v391_v44 = vmax.f32 %v354_v34, 0.0  ;;  %v399_v45 = vmax.f32 %v374_v35, 0.0  ;;  %v358_v46 = vadd.f32 %v357_v42, %v210_v27  ;;  %v378_v47 = vadd.f32 %v377_v43, %v210_v27 }
  0xff   : > { %v392_v48 = vmax.f32 %v356_v40, 0.0  ;;  %v400_v49 = vmax.f32 %v376_v41, 0.0 }
 0x100   : > { %v561_v50 = vpack.c.bf16 %v391_v44, %v390_v38  ;;  %v565_v51 = vpack.c.bf16 %v399_v45, %v398_v39  ;;  %v393_v52 = vmax.f32 %v358_v46, 0.0  ;;  %v401_v53 = vmax.f32 %v378_v47, 0.0 }
 0x102   : > { %454 = vst [vmem:[%s726_s4] sm:$0xff] %v561_v50  ;;  %458 = vst [vmem:[%s726_s4 + $0x20] sm:$0xff] %v565_v51  ;;  %v562_v54 = vpack.c.bf16 %v393_v52, %v392_v48  ;;  %v566_v55 = vpack.c.bf16 %v401_v53, %v400_v49  ;;  %v361_v56 = vpop.f32.mrb[4].mxu0  ;;  %v381_v57 = vpop.f32.mrb[4].mxu1 }
 0x103   : > { %v362_v58 = vadd.f32 %v361_v56, %v206_v26  ;;  %v382_v59 = vadd.f32 %v381_v57, %v206_v26  ;;  %v363_v60 = vpop.f32.mrb[5].mxu0  ;;  %v383_v61 = vpop.f32.mrb[5].mxu1 }
 0x104   : > { %455 = vst [vmem:[%s726_s4 + $0x8] sm:$0xff] %v562_v54  ;;  %459 = vst [vmem:[%s726_s4 + $0x28] sm:$0xff] %v566_v55  ;;  %v364_v62 = vadd.f32 %v363_v60, %v210_v27  ;;  %v384_v63 = vadd.f32 %v383_v61, %v210_v27  ;;  %v365_v0 = vpop.f32.mrb[6].mxu0  ;;  %v385_v1 = vpop.f32.mrb[6].mxu1 }
 0x105   : > { %v394_v2 = vmax.f32 %v362_v58, 0.0  ;;  %v402_v3 = vmax.f32 %v382_v59, 0.0  ;;  %v366_v4 = vadd.f32 %v365_v0, %v206_v26  ;;  %v386_v5 = vadd.f32 %v385_v1, %v206_v26  ;;  %v367_v6 = vpop.f32.mrb[7].mxu0  ;;  %v387_v7 = vpop.f32.mrb[7].mxu1 }
 0x106   : > { %v395_v8 = vmax.f32 %v364_v62, 0.0  ;;  %v403_v9 = vmax.f32 %v384_v63, 0.0  ;;  %v368_v10 = vadd.f32 %v367_v6, %v210_v27  ;;  %v388_v11 = vadd.f32 %v387_v7, %v210_v27 }
 0x107   : > { %v396_v12 = vmax.f32 %v366_v4, 0.0  ;;  %v404_v13 = vmax.f32 %v386_v5, 0.0 }
 0x108   : > { %v563_v14 = vpack.c.bf16 %v395_v8, %v394_v2  ;;  %v567_v15 = vpack.c.bf16 %v403_v9, %v402_v3  ;;  %v397_v16 = vmax.f32 %v368_v10, 0.0  ;;  %v405_v17 = vmax.f32 %v388_v11, 0.0 }
 0x10a   : > { %456 = vst [vmem:[%s726_s4 + $0x10] sm:$0xff] %v563_v14  ;;  %460 = vst [vmem:[%s726_s4 + $0x30] sm:$0xff] %v567_v15  ;;  %v564_v18 = vpack.c.bf16 %v397_v16, %v396_v12  ;;  %v568_v19 = vpack.c.bf16 %v405_v17, %v404_v13 }
 0x10c   : > { %457 = vst [vmem:[%s726_s4 + $0x18] sm:$0xff] %v564_v18  ;;  %461 = vst [vmem:[%s726_s4 + $0x38] sm:$0xff] %v568_v19 }
 0x10d PF: > { %s13_s12 = sadd.s32 1, %s628_s12  }
 0x10e   : > { %p10_p4 = scmp.ge.s32.totalorder %s13_s12, 4  }
 0x110   :  { %12 = sbr.rel (!%p10_p4) target bundleno = 1 (0x1), region = 62 }

// kernel: a_call__.8
= control target key start
LH: loop header
LB: loop body
LE: loop exit
PB: predicated region body
PF: predicated region fallthrough
CT: control target
= control target key end

     0   :  { %s610_s12 = smov 0   ;;  %s667_s0 = inlined_call_operand.vmem [shape: bf16[128,128], index: 0, kind: input, shape index: {}]   ;;  %s668_s1 = inlined_call_operand.vmem [shape: bf16[128,128], index: 1, kind: input, shape index: {}]   ;;  %s669_s2 = inlined_call_operand.vmem [shape: f32[1,128], index: 2, kind: input, shape index: {}]   ;;  %s670_s3 = inlined_call_operand.vmem [shape: bf16[128,128], index: 3, kind: output, shape index: {}]  }
   0x1 LB: > { %s447_s13 = sadd.s32 4294967295, %s588_s12   ;;  %p451_p0 = scmp.ge.s32.totalorder %s588_s12, 1  ;;  %s588_s12 = sphi %s610_s12, %s13_s12  }
   0x2   : > { %p138_p1 = scmp.lt.s32.totalorder %s588_s12, 3 }
   0x4   : > { %p139_p2 = pnand %p451_p0, %p138_p1 }
   0x5   : > { %v570_v0 = vld [vmem:[%s668_s1] sm:$0xff] (!%p139_p2)   ;;  %s452_s16 = sshll.u32 (!%p139_p2), %s447_s13, 3  ;;  %v571_v1 = vld [vmem:[%s668_s1 + $0x8] sm:$0xff] (!%p139_p2)   ;;  %v572_v2 = vld [vmem:[%s668_s1 + $0x10] sm:$0xff] (!%p139_p2)  }
   0x6   : > { %142 = sbr.rel (%p139_p2) target bundleno = 260 (0x104), region = 32  ;;  %p163_p3 = scmp.lt.s32.totalorder (!%p139_p2), %s452_s16, 15  ;;  %522 = vmatprep.subr.bf16.mxu0 (!%p139_p2), %v570_v0  ;;  %546 = vmatprep.subr.bf16.mxu1 (!%p139_p2), %v570_v0  ;;  %v573_v3 = vld [vmem:[%s668_s1 + $0x18] sm:$0xff] (!%p139_p2)   ;;  %v574_v6 = vld [vmem:[%s668_s1 + $0x20] sm:$0xff] (!%p139_p2)   ;;  %v575_v7 = vld [vmem:[%s668_s1 + $0x28] sm:$0xff] (!%p139_p2)  }
   0x7   : > { %523 = vmatpush3.bf16.msra.mxu0 (!%p139_p2), %v570_v0  ;;  %554 = vmatpush3.bf16.msra.mxu1 (!%p139_p2), %v570_v0  ;;  %v576_v8 = vld [vmem:[%s668_s1 + $0x30] sm:$0xff] (!%p139_p2)   ;;  %v577_v9 = vld [vmem:[%s668_s1 + $0x38] sm:$0xff] (!%p139_p2)   ;;  %v456_v12 = vld [vmem:[%s669_s2] ss:$0 sm:$0xff] (!%p139_p2) }
   0x8   : > { %524 = vmatprep.subr.bf16.mxu0 (!%p139_p2), %v571_v1  ;;  %547 = vmatprep.subr.bf16.mxu1 (!%p139_p2), %v571_v1 }
   0xb   : > { %525 = vmatpush3.bf16.msra.mxu0 (!%p139_p2), %v571_v1  ;;  %555 = vmatpush3.bf16.msra.mxu1 (!%p139_p2), %v571_v1 }
   0xc   : > { %526 = vmatprep.subr.bf16.mxu0 (!%p139_p2), %v572_v2  ;;  %548 = vmatprep.subr.bf16.mxu1 (!%p139_p2), %v572_v2 }
   0xd   : > { %s672_s16 = smov (!%p163_p3, %s452_s16), 15 }
   0xe   : > { %s453_s21 = sshll.u32 %s672_s16, 2 }
   0xf   : > { %s635_s24 = scalar_lea.vmem %s667_s0, %s453_s21  ;;  %527 = vmatpush3.bf16.msra.mxu0 %v572_v2  ;;  %556 = vmatpush3.bf16.msra.mxu1 %v572_v2  ;;  %s172_s13 = scalar_lea.vmem %s670_s3, %s453_s21 }
  0x10   : > { %v578_v4 = vld [vmem:[%s635_s24] sm:$0xff]   ;;  %v579_v5 = vld [vmem:[%s635_s24 + $0x10] sm:$0xff]   ;;  %528 = vmatprep.subr.bf16.mxu0 %v573_v3  ;;  %549 = vmatprep.subr.bf16.mxu1 %v573_v3  ;;  %v580_v10 = vld [vmem:[%s635_s24 + $0x8] sm:$0xff]  }
  0x11   : > { %538 = vmatprep.mubr.bf16.mxu0 %v578_v4  ;;  %542 = vmatprep.mubr.bf16.mxu1 %v579_v5  ;;  %v581_v11 = vld [vmem:[%s635_s24 + $0x18] sm:$0xff]  }
  0x13   : > { %529 = vmatpush3.bf16.msra.mxu0 %v573_v3  ;;  %557 = vmatpush3.bf16.msra.mxu1 %v573_v3 }
  0x14   : > { %530 = vmatprep.subr.bf16.mxu0 %v574_v6  ;;  %550 = vmatprep.subr.bf16.mxu1 %v574_v6 }
  0x17   : > { %531 = vmatpush3.bf16.msra.mxu0 %v574_v6  ;;  %558 = vmatpush3.bf16.msra.mxu1 %v574_v6 }
  0x18   : > { %532 = vmatprep.subr.bf16.mxu0 %v575_v7  ;;  %551 = vmatprep.subr.bf16.mxu1 %v575_v7 }
  0x1b   : > { %533 = vmatpush3.bf16.msra.mxu0 %v575_v7  ;;  %559 = vmatpush3.bf16.msra.mxu1 %v575_v7 }
  0x1c   : > { %534 = vmatprep.subr.bf16.mxu0 %v576_v8  ;;  %552 = vmatprep.subr.bf16.mxu1 %v576_v8 }
  0x1f   : > { %535 = vmatpush3.bf16.msra.mxu0 %v576_v8  ;;  %560 = vmatpush3.bf16.msra.mxu1 %v576_v8 }
  0x20   : > { %536 = vmatprep.subr.bf16.mxu0 %v577_v9  ;;  %553 = vmatprep.subr.bf16.mxu1 %v577_v9 }
  0x23   : > { %537 = vmatpush3.bf16.msra.mxu0 %v577_v9  ;;  %561 = vmatpush3.bf16.msra.mxu1 %v577_v9 }
  0x26   : > { %539 = vmatmul.mubr.bf16.vlgmr.msra.gmra.mrb[0].mxu0 %v580_v10  ;;  %543 = vmatmul.mubr.bf16.vlgmr.msra.gmra.mrb[0].mxu1 %v581_v11 }
  0xf9   : > { %v540_v13 = vpop.f32.mrb[0].mxu0  ;;  %v544_v14 = vpop.f32.mrb[0].mxu1 }
  0xfa   : > { %v321_v15 = vadd.f32 %v540_v13, %v456_v12  ;;  %v337_v16 = vadd.f32 %v544_v14, %v456_v12  ;;  %v312_v17 = vpop.f32.mrb[1].mxu0  ;;  %v328_v18 = vpop.f32.mrb[1].mxu1 }
  0xfb   : > { %v313_v19 = vadd.f32 %v456_v12, %v312_v17  ;;  %v329_v20 = vadd.f32 %v456_v12, %v328_v18  ;;  %v541_v21 = vpop.f32.mrb[2].mxu0  ;;  %v545_v22 = vpop.f32.mrb[2].mxu1 }
  0xfc   : > { %v324_v23 = vadd.f32 %v541_v21, %v456_v12  ;;  %v340_v24 = vadd.f32 %v545_v22, %v456_v12  ;;  %v315_v25 = vpop.f32.mrb[3].mxu0  ;;  %v331_v26 = vpop.f32.mrb[3].mxu1  ;;  %v345_v29 = vmax.f32 %v321_v15, 0.0  ;;  %v349_v30 = vmax.f32 %v337_v16, 0.0 }
  0xfd   : > { %v316_v27 = vadd.f32 %v456_v12, %v315_v25  ;;  %v332_v28 = vadd.f32 %v456_v12, %v331_v26  ;;  %v343_v33 = vmax.f32 %v313_v19, 0.0  ;;  %v347_v34 = vmax.f32 %v329_v20, 0.0 }
  0xfe   : > { %v346_v31 = vmax.f32 %v324_v23, 0.0  ;;  %v350_v32 = vmax.f32 %v340_v24, 0.0 }
  0xff   : > { %v344_v35 = vmax.f32 %v316_v27, 0.0  ;;  %v348_v36 = vmax.f32 %v332_v28, 0.0 }
 0x100   : > { %v495_v37 = vpack.c.bf16 %v346_v31, %v345_v29  ;;  %v505_v38 = vpack.c.bf16 %v350_v32, %v349_v30 }
 0x101   : > { %v490_v39 = vpack.c.bf16 %v344_v35, %v343_v33  ;;  %v500_v40 = vpack.c.bf16 %v348_v36, %v347_v34 }
 0x102   : > { %507 = vst [vmem:[%s172_s13 + $0x8] sm:$0xff] %v495_v37   ;;  %509 = vst [vmem:[%s172_s13 + $0x18] sm:$0xff] %v505_v38  }
 0x103   : > { %491 = vst [vmem:[%s172_s13] sm:$0xff] %v490_v39   ;;  %508 = vst [vmem:[%s172_s13 + $0x10] sm:$0xff] %v500_v40  }
 0x104 PF: > { %s13_s12 = sadd.s32 1, %s588_s12  }
 0x105   : > { %p10_p4 = scmp.ge.s32.totalorder %s13_s12, 4  }
 0x107   :  { %12 = sbr.rel (!%p10_p4) target bundleno = 1 (0x1), region = 62 }

// kernel: a_call__.7
= control target key start
LH: loop header
LB: loop body
LE: loop exit
PB: predicated region body
PF: predicated region fallthrough
CT: control target
= control target key end

     0   :  { %s839_s9 = smov 0   ;;  %s841_s10 = smov 0   ;;  %s934_s0 = inlined_call_operand.vmem [shape: bf16[128,256], index: 0, kind: input, shape index: {}]   ;;  %s935_s1 = inlined_call_operand.vmem [shape: bf16[256,128], index: 1, kind: input, shape index: {}]   ;;  %s936_s2 = inlined_call_operand.vmem [shape: bf16[128,128], index: 2, kind: output, shape index: {}]  }
   0x1   :  { %s843_s11 = smov 0  }
   0x2 LB: > { %s24_s12 = sadd.s32 1, %s818_s10  ;;  %p620_p0 = scmp.ge.s32.totalorder %s822_s11, 1  ;;  %s822_s11 = sphi %s843_s11, %s12_s11   ;;  %s818_s10 = sphi %s841_s10, %s938_s10   ;;  %s814_s9 = sphi %s839_s9, %s937_s9  }
   0x3   : > { %p26_p1 = scmp.ge.s32.totalorder %s24_s12, 2  ;;  %p144_p2 = scmp.lt.s32.totalorder %s822_s11, 3 }
   0x5   : > { %s940_s12 = smov (%p26_p1, %s24_s12), 0  ;;  %p145_p3 = pnand %p620_p0, %p144_p2 }
   0x6   : > { %v772_v0 = vld [vmem:[%s935_s1 + $0x40] sm:$0xff] (!%p145_p3)   ;;  %s621_s15 = sshll.u32 (!%p145_p3), %s814_s9, 3  ;;  %v774_v2 = vld [vmem:[%s935_s1 + $0x48] sm:$0xff] (!%p145_p3)   ;;  %v776_v4 = vld [vmem:[%s935_s1 + $0x50] sm:$0xff] (!%p145_p3)  }
   0x7   : > { %148 = sbr.rel (%p145_p3) target bundleno = 267 (0x10b), region = 28  ;;  %v773_v1 = vld [vmem:[%s935_s1] sm:$0xff] (!%p145_p3)   ;;  %692 = vmatprep.subr.bf16.mxu0 (!%p145_p3), %v772_v0  ;;  %732 = vmatprep.subr.bf16.mxu1 (!%p145_p3), %v772_v0  ;;  %v775_v3 = vld [vmem:[%s935_s1 + $0x8] sm:$0xff] (!%p145_p3)   ;;  %p178_p4 = scmp.lt.s32.totalorder (!%p145_p3), %s621_s15, 15  ;;  %v777_v5 = vld [vmem:[%s935_s1 + $0x10] sm:$0xff] (!%p145_p3)  }
   0x8   : > { %693 = vmatpush3.bf16.msra.mxu0 (!%p145_p3), %v773_v1  ;;  %740 = vmatpush3.bf16.msra.mxu1 (!%p145_p3), %v773_v1  ;;  %v778_v6 = vld [vmem:[%s935_s1 + $0x58] sm:$0xff] (!%p145_p3)   ;;  %v780_v8 = vld [vmem:[%s935_s1 + $0x60] sm:$0xff] (!%p145_p3)   ;;  %v782_v10 = vld [vmem:[%s935_s1 + $0x68] sm:$0xff] (!%p145_p3)  }
   0x9   : > { %694 = vmatprep.subr.bf16.mxu0 (!%p145_p3), %v774_v2  ;;  %733 = vmatprep.subr.bf16.mxu1 (!%p145_p3), %v774_v2  ;;  %v779_v7 = vld [vmem:[%s935_s1 + $0x18] sm:$0xff] (!%p145_p3)   ;;  %v781_v9 = vld [vmem:[%s935_s1 + $0x20] sm:$0xff] (!%p145_p3)   ;;  %v783_v13 = vld [vmem:[%s935_s1 + $0x28] sm:$0xff] (!%p145_p3)  }
   0xa   : > { %v784_v14 = vld [vmem:[%s935_s1 + $0x70] sm:$0xff] (!%p145_p3)   ;;  %v786_v16 = vld [vmem:[%s935_s1 + $0x78] sm:$0xff] (!%p145_p3)  }
   0xb   : > { %v785_v15 = vld [vmem:[%s935_s1 + $0x30] sm:$0xff] (!%p145_p3)   ;;  %v787_v17 = vld [vmem:[%s935_s1 + $0x38] sm:$0xff] (!%p145_p3)  }
   0xc   : > { %695 = vmatpush3.bf16.msra.mxu0 (!%p145_p3), %v775_v3  ;;  %741 = vmatpush3.bf16.msra.mxu1 (!%p145_p3), %v775_v3 }
   0xd   : > { %696 = vmatprep.subr.bf16.mxu0 (!%p145_p3), %v776_v4  ;;  %734 = vmatprep.subr.bf16.mxu1 (!%p145_p3), %v776_v4 }
   0xe   : > { %s942_s15 = smov (!%p178_p4, %s621_s15), 15 }
   0xf   : > { %s660_s30 = sshll.u32 %s942_s15, 3  ;;  %s625_s26 = sshll.u32 %s942_s15, 2 }
  0x10   : > { %697 = vmatpush3.bf16.msra.mxu0 %v777_v5  ;;  %742 = vmatpush3.bf16.msra.mxu1 %v777_v5  ;;  %s890_s7 = scalar_lea.vmem %s934_s0, %s660_s30  ;;  %s198_s29 = scalar_lea.vmem %s936_s2, %s625_s26 }
  0x11   : > { %698 = vmatprep.subr.bf16.mxu0 %v778_v6  ;;  %735 = vmatprep.subr.bf16.mxu1 %v778_v6  ;;  %v790_v11 = vld [vmem:[%s890_s7 + $0x4] ss:$8 sps:$4 sm:$0xff]   ;;  %v788_v18 = vld [vmem:[%s890_s7] ss:$8 sps:$4 sm:$0xff]   ;;  %v794_v20 = vld [vmem:[%s890_s7 + $0x14] ss:$8 sps:$4 sm:$0xff]  }
  0x12   : > { %v793_v12 = vld [vmem:[%s890_s7 + $0x24] ss:$8 sps:$4 sm:$0xff]   ;;  %429 = vmatprep.mubr.bf16.mxu0 %v790_v11  ;;  %v791_v19 = vld [vmem:[%s890_s7 + $0x20] ss:$8 sps:$4 sm:$0xff]   ;;  %v796_v21 = vld [vmem:[%s890_s7 + $0x34] ss:$8 sps:$4 sm:$0xff]  }
  0x13   : > { %445 = vmatprep.mubr.bf16.mxu1 %v793_v12  ;;  %v798_v22 = vld [vmem:[%s890_s7 + $0x10] ss:$8 sps:$4 sm:$0xff]  }
  0x14   : > { %699 = vmatpush3.bf16.msra.mxu0 %v779_v7  ;;  %743 = vmatpush3.bf16.msra.mxu1 %v779_v7  ;;  %v799_v23 = vld [vmem:[%s890_s7 + $0x30] ss:$8 sps:$4 sm:$0xff]  }
  0x15   : > { %700 = vmatprep.subr.bf16.mxu0 %v780_v8  ;;  %736 = vmatprep.subr.bf16.mxu1 %v780_v8 }
  0x18   : > { %701 = vmatpush3.bf16.msra.mxu0 %v781_v9  ;;  %744 = vmatpush3.bf16.msra.mxu1 %v781_v9 }
  0x19   : > { %702 = vmatprep.subr.bf16.mxu0 %v782_v10  ;;  %737 = vmatprep.subr.bf16.mxu1 %v782_v10 }
  0x1c   : > { %703 = vmatpush3.bf16.msra.mxu0 %v783_v13  ;;  %745 = vmatpush3.bf16.msra.mxu1 %v783_v13 }
  0x1d   : > { %704 = vmatprep.subr.bf16.mxu0 %v784_v14  ;;  %738 = vmatprep.subr.bf16.mxu1 %v784_v14 }
  0x20   : > { %705 = vmatpush3.bf16.msra.mxu0 %v785_v15  ;;  %746 = vmatpush3.bf16.msra.mxu1 %v785_v15 }
  0x21   : > { %706 = vmatprep.subr.bf16.mxu0 %v786_v16  ;;  %739 = vmatprep.subr.bf16.mxu1 %v786_v16 }
  0x24   : > { %707 = vmatpush3.bf16.msra.mxu0 %v787_v17  ;;  %747 = vmatpush3.bf16.msra.mxu1 %v787_v17 }
  0x27   : > { %430 = vmatmul.mubr.bf16.vlgmr.msra.gmra.mrb[0].mxu0 %v788_v18  ;;  %446 = vmatmul.mubr.bf16.vlgmr.msra.gmra.mrb[0].mxu1 %v791_v19 }
  0x28   : > { %437 = vmatprep.mubr.bf16.mxu0 %v794_v20  ;;  %453 = vmatprep.mubr.bf16.mxu1 %v796_v21 }
  0x2f   : > { %438 = vmatmul.mubr.bf16.gmra.mrb[4].mxu0 %v798_v22  ;;  %454 = vmatmul.mubr.bf16.gmra.mrb[4].mxu1 %v799_v23 }
  0xfa   : > { %v708_v24 = vpop.f32.mrb[0].mxu0  ;;  %v720_v25 = vpop.f32.mrb[0].mxu1 }
  0xfb   : > { %v709_v26 = vpop.f32.mrb[1].mxu0  ;;  %v721_v27 = vpop.f32.mrb[1].mxu1 }
  0xfc   : > { %v710_v28 = vadd.f32 %v709_v26, %v708_v24  ;;  %v722_v29 = vadd.f32 %v721_v27, %v720_v25  ;;  %v711_v30 = vpop.f32.mrb[2].mxu0  ;;  %v723_v31 = vpop.f32.mrb[2].mxu1 }
  0xfd   : > { %v712_v32 = vpop.f32.mrb[3].mxu0  ;;  %v724_v33 = vpop.f32.mrb[3].mxu1 }
  0xfe   : > { %v713_v34 = vadd.f32 %v712_v32, %v711_v30  ;;  %v725_v35 = vadd.f32 %v724_v33, %v723_v31 }
 0x100   : > { %v672_v36 = vpack.c.bf16 %v713_v34, %v710_v28  ;;  %v682_v37 = vpack.c.bf16 %v725_v35, %v722_v29 }
 0x102   : > { %673 = vst [vmem:[%s198_s29] sm:$0xff] %v672_v36   ;;  %690 = vst [vmem:[%s198_s29 + $0x10] sm:$0xff] %v682_v37   ;;  %v714_v38 = vpop.f32.mrb[4].mxu0  ;;  %v726_v39 = vpop.f32.mrb[4].mxu1 }
 0x103   : > { %v715_v40 = vpop.f32.mrb[5].mxu0  ;;  %v727_v41 = vpop.f32.mrb[5].mxu1 }
 0x104   : > { %v716_v42 = vadd.f32 %v715_v40, %v714_v38  ;;  %v728_v43 = vadd.f32 %v727_v41, %v726_v39  ;;  %v717_v44 = vpop.f32.mrb[6].mxu0  ;;  %v729_v45 = vpop.f32.mrb[6].mxu1 }
 0x105   : > { %v718_v46 = vpop.f32.mrb[7].mxu0  ;;  %v730_v47 = vpop.f32.mrb[7].mxu1 }
 0x106   : > { %v719_v48 = vadd.f32 %v718_v46, %v717_v44  ;;  %v731_v49 = vadd.f32 %v730_v47, %v729_v45 }
 0x108   : > { %v677_v50 = vpack.c.bf16 %v719_v48, %v716_v42  ;;  %v687_v51 = vpack.c.bf16 %v731_v49, %v728_v43 }
 0x10a   : > { %689 = vst [vmem:[%s198_s29 + $0x8] sm:$0xff] %v677_v50   ;;  %691 = vst [vmem:[%s198_s29 + $0x18] sm:$0xff] %v687_v51  }
 0x10b PF: > { %s12_s11 = sadd.s32 1, %s822_s11   ;;  %s937_s9 = smov %s818_s10 }
 0x10c   : > { %p9_p5 = scmp.ge.s32.totalorder %s12_s11, 4   ;;  %s938_s10 = smov %s940_s12 }
 0x10e   :  { %11 = sbr.rel (!%p9_p5) target bundleno = 2 (0x2), region = 69 }

// kernel: a_call__.5
= control target key start
LH: loop header
LB: loop body
LE: loop exit
PB: predicated region body
PF: predicated region fallthrough
CT: control target
= control target key end

     0   :  { %s786_s9 = smov 0   ;;  %s788_s10 = smov 0   ;;  %s877_s0 = inlined_call_operand.vmem [shape: bf16[128,128], index: 0, kind: input, shape index: {}]   ;;  %s878_s1 = inlined_call_operand.vmem [shape: bf16[128,256], index: 1, kind: input, shape index: {}]   ;;  %s879_s2 = inlined_call_operand.vmem [shape: bf16[128,256], index: 2, kind: output, shape index: {}]  }
   0x1   :  { %s790_s11 = smov 0  }
   0x2 LB: > { %s24_s12 = sadd.s32 1, %s764_s10  ;;  %p632_p0 = scmp.ge.s32.totalorder %s768_s11, 1  ;;  %s768_s11 = sphi %s790_s11, %s12_s11   ;;  %s764_s10 = sphi %s788_s10, %s881_s10   ;;  %s760_s9 = sphi %s786_s9, %s880_s9  }
   0x3   : > { %p26_p1 = scmp.ge.s32.totalorder %s24_s12, 2  ;;  %p142_p2 = scmp.lt.s32.totalorder %s768_s11, 3 }
   0x5   : > { %s883_s12 = smov (%p26_p1, %s24_s12), 0  ;;  %p143_p3 = pnand %p632_p0, %p142_p2 }
   0x6   : > { %v718_v0 = vld [vmem:[%s878_s1 + $0x4] ss:$8 sps:$4 sm:$0xff] (!%p143_p3)   ;;  %s633_s15 = sshll.u32 (!%p143_p3), %s760_s9, 3  ;;  %v720_v1 = vld [vmem:[%s878_s1] ss:$8 sps:$4 sm:$0xff] (!%p143_p3)   ;;  %v770_v2 = vmov (!%p143_p3), 0  }
   0x7   : > { %146 = sbr.rel (%p143_p3) target bundleno = 266 (0x10a), region = 28  ;;  %394 = vmatprep.mubr.bf16.mxu0 (!%p143_p3), %v770_v2  ;;  %414 = vmatprep.mubr.bf16.mxu1 (!%p143_p3), %v770_v2  ;;  %p175_p4 = scmp.lt.s32.totalorder (!%p143_p3), %s633_s15, 15  ;;  %v721_v3 = vld [vmem:[%s878_s1 + $0x14] ss:$8 sps:$4 sm:$0xff] (!%p143_p3)   ;;  %v723_v4 = vld [vmem:[%s878_s1 + $0x10] ss:$8 sps:$4 sm:$0xff] (!%p143_p3)  }
   0x8   : > { %362 = vmatprep.subr.bf16.mxu0 (!%p143_p3), %v718_v0  ;;  %677 = vmatprep.subr.bf16.mxu1 (!%p143_p3), %v718_v0  ;;  %v724_v5 = vld [vmem:[%s878_s1 + $0x24] ss:$8 sps:$4 sm:$0xff] (!%p143_p3)   ;;  %v726_v6 = vld [vmem:[%s878_s1 + $0x20] ss:$8 sps:$4 sm:$0xff] (!%p143_p3)   ;;  %v727_v7 = vld [vmem:[%s878_s1 + $0x34] ss:$8 sps:$4 sm:$0xff] (!%p143_p3)  }
   0x9   : > { %363 = vmatpush1.bf16.msra.mxu0 (!%p143_p3), %v720_v1  ;;  %685 = vmatpush1.bf16.msra.mxu1 (!%p143_p3), %v720_v1  ;;  %v729_v8 = vld [vmem:[%s878_s1 + $0x30] ss:$8 sps:$4 sm:$0xff] (!%p143_p3)   ;;  %v730_v9 = vld [vmem:[%s878_s1 + $0x44] ss:$8 sps:$4 sm:$0xff] (!%p143_p3)   ;;  %v732_v10 = vld [vmem:[%s878_s1 + $0x40] ss:$8 sps:$4 sm:$0xff] (!%p143_p3)  }
   0xa   : > { %364 = vmatprep.subr.bf16.mxu0 (!%p143_p3), %v721_v3  ;;  %678 = vmatprep.subr.bf16.mxu1 (!%p143_p3), %v721_v3  ;;  %v733_v11 = vld [vmem:[%s878_s1 + $0x54] ss:$8 sps:$4 sm:$0xff] (!%p143_p3)   ;;  %v735_v12 = vld [vmem:[%s878_s1 + $0x50] ss:$8 sps:$4 sm:$0xff] (!%p143_p3)   ;;  %v736_v13 = vld [vmem:[%s878_s1 + $0x64] ss:$8 sps:$4 sm:$0xff] (!%p143_p3)  }
   0xb   : > { %v738_v14 = vld [vmem:[%s878_s1 + $0x60] ss:$8 sps:$4 sm:$0xff] (!%p143_p3)   ;;  %v739_v15 = vld [vmem:[%s878_s1 + $0x74] ss:$8 sps:$4 sm:$0xff] (!%p143_p3)   ;;  %v741_v16 = vld [vmem:[%s878_s1 + $0x70] ss:$8 sps:$4 sm:$0xff] (!%p143_p3)  }
   0xd   : > { %365 = vmatpush1.bf16.msra.mxu0 (!%p143_p3), %v723_v4  ;;  %686 = vmatpush1.bf16.msra.mxu1 (!%p143_p3), %v723_v4 }
   0xe   : > { %s885_s15 = smov (!%p175_p4, %s633_s15), 15  ;;  %366 = vmatprep.subr.bf16.mxu0 %v724_v5  ;;  %679 = vmatprep.subr.bf16.mxu1 %v724_v5 }
   0xf   : > { %s634_s24 = sshll.u32 %s885_s15, 2  ;;  %s668_s26 = sshll.u32 %s885_s15, 3 }
  0x10   : > { %s831_s3 = scalar_lea.vmem %s877_s0, %s634_s24  ;;  %s195_s29 = scalar_lea.vmem %s879_s2, %s668_s26 }
  0x11   : > { %367 = vmatpush1.bf16.msra.mxu0 %v726_v6  ;;  %687 = vmatpush1.bf16.msra.mxu1 %v726_v6  ;;  %v742_v17 = vld [vmem:[%s831_s3] sm:$0xff]   ;;  %v743_v18 = vld [vmem:[%s831_s3 + $0x10] sm:$0xff]   ;;  %v744_v19 = vld [vmem:[%s831_s3 + $0x8] sm:$0xff]  }
  0x12   : > { %368 = vmatprep.subr.bf16.mxu0 %v727_v7  ;;  %680 = vmatprep.subr.bf16.mxu1 %v727_v7  ;;  %v745_v20 = vld [vmem:[%s831_s3 + $0x18] sm:$0xff]  }
  0x15   : > { %369 = vmatpush1.bf16.msra.mxu0 %v729_v8  ;;  %688 = vmatpush1.bf16.msra.mxu1 %v729_v8 }
  0x16   : > { %370 = vmatprep.subr.bf16.mxu0 %v730_v9  ;;  %681 = vmatprep.subr.bf16.mxu1 %v730_v9 }
  0x19   : > { %371 = vmatpush1.bf16.msra.mxu0 %v732_v10  ;;  %689 = vmatpush1.bf16.msra.mxu1 %v732_v10 }
  0x1a   : > { %372 = vmatprep.subr.bf16.mxu0 %v733_v11  ;;  %682 = vmatprep.subr.bf16.mxu1 %v733_v11 }
  0x1d   : > { %373 = vmatpush1.bf16.msra.mxu0 %v735_v12  ;;  %690 = vmatpush1.bf16.msra.mxu1 %v735_v12 }
  0x1e   : > { %374 = vmatprep.subr.bf16.mxu0 %v736_v13  ;;  %683 = vmatprep.subr.bf16.mxu1 %v736_v13 }
  0x21   : > { %375 = vmatpush1.bf16.msra.mxu0 %v738_v14  ;;  %691 = vmatpush1.bf16.msra.mxu1 %v738_v14 }
  0x22   : > { %376 = vmatprep.subr.bf16.mxu0 %v739_v15  ;;  %684 = vmatprep.subr.bf16.mxu1 %v739_v15 }
  0x25   : > { %377 = vmatpush1.bf16.msra.mxu0 %v741_v16  ;;  %692 = vmatpush1.bf16.msra.mxu1 %v741_v16 }
  0x28   : > { %395 = vmatmul.mubr.bf16.vlgmr.msra.gmra.mrb[0].mxu0 %v742_v17  ;;  %415 = vmatmul.mubr.bf16.vlgmr.msra.gmra.mrb[0].mxu1 %v743_v18 }
  0x29   : > { %404 = vmatprep.mubr.bf16.mxu0 %v770_v2  ;;  %424 = vmatprep.mubr.bf16.mxu1 %v770_v2 }
  0x30   : > { %405 = vmatmul.mubr.bf16.gmra.mrb[4].mxu0 %v744_v19  ;;  %425 = vmatmul.mubr.bf16.gmra.mrb[4].mxu1 %v745_v20 }
  0xfb   : > { %v396_v21 = vpop.f32.mrb[0].mxu0  ;;  %v416_v22 = vpop.f32.mrb[0].mxu1 }
  0xfc   : > { %v398_v23 = vpop.f32.mrb[1].mxu0  ;;  %v418_v24 = vpop.f32.mrb[1].mxu1 }
  0xfd   : > { %v669_v25 = vpack.c.bf16 %v398_v23, %v396_v21  ;;  %v673_v26 = vpack.c.bf16 %v418_v24, %v416_v22  ;;  %v400_v27 = vpop.f32.mrb[2].mxu0  ;;  %v420_v28 = vpop.f32.mrb[2].mxu1 }
  0xfe   : > { %v402_v29 = vpop.f32.mrb[3].mxu0  ;;  %v422_v30 = vpop.f32.mrb[3].mxu1 }
  0xff   : > { %534 = vst [vmem:[%s195_s29] sm:$0xff] %v669_v25  ;;  %538 = vst [vmem:[%s195_s29 + $0x20] sm:$0xff] %v673_v26  ;;  %v670_v31 = vpack.c.bf16 %v402_v29, %v400_v27  ;;  %v674_v32 = vpack.c.bf16 %v422_v30, %v420_v28 }
 0x101   : > { %535 = vst [vmem:[%s195_s29 + $0x8] sm:$0xff] %v670_v31  ;;  %539 = vst [vmem:[%s195_s29 + $0x28] sm:$0xff] %v674_v32 }
 0x103   : > { %v406_v33 = vpop.f32.mrb[4].mxu0  ;;  %v426_v34 = vpop.f32.mrb[4].mxu1 }
 0x104   : > { %v408_v35 = vpop.f32.mrb[5].mxu0  ;;  %v428_v36 = vpop.f32.mrb[5].mxu1 }
 0x105   : > { %v671_v37 = vpack.c.bf16 %v408_v35, %v406_v33  ;;  %v675_v38 = vpack.c.bf16 %v428_v36, %v426_v34  ;;  %v410_v39 = vpop.f32.mrb[6].mxu0  ;;  %v430_v40 = vpop.f32.mrb[6].mxu1 }
 0x106   : > { %v412_v41 = vpop.f32.mrb[7].mxu0  ;;  %v432_v42 = vpop.f32.mrb[7].mxu1 }
 0x107   : > { %536 = vst [vmem:[%s195_s29 + $0x10] sm:$0xff] %v671_v37  ;;  %540 = vst [vmem:[%s195_s29 + $0x30] sm:$0xff] %v675_v38  ;;  %v672_v43 = vpack.c.bf16 %v412_v41, %v410_v39  ;;  %v676_v44 = vpack.c.bf16 %v432_v42, %v430_v40 }
 0x109   : > { %537 = vst [vmem:[%s195_s29 + $0x18] sm:$0xff] %v672_v43  ;;  %541 = vst [vmem:[%s195_s29 + $0x38] sm:$0xff] %v676_v44 }
 0x10a PF: > { %s12_s11 = sadd.s32 1, %s768_s11   ;;  %s880_s9 = smov %s764_s10 }
 0x10b   : > { %p9_p5 = scmp.ge.s32.totalorder %s12_s11, 4   ;;  %s881_s10 = smov %s883_s12 }
 0x10d   :  { %11 = sbr.rel (!%p9_p5) target bundleno = 2 (0x2), region = 69 }

// kernel: a_call__.9
= control target key start
LH: loop header
LB: loop body
LE: loop exit
PB: predicated region body
PF: predicated region fallthrough
CT: control target
= control target key end

     0   :  { %s732_s15 = smov 0   ;;  %s810_s0 = inlined_call_operand.vmem [shape: bf16[128,128], index: 0, kind: input, shape index: {}]   ;;  %s811_s1 = inlined_call_operand.vmem [shape: bf16[128,128], index: 1, kind: input, shape index: {}]   ;;  %s812_s2 = inlined_call_operand.vmem [shape: bf16[128,128], index: 2, kind: input, shape index: {}]   ;;  %s813_s3 = inlined_call_operand.vmem [shape: f32[1,128], index: 3, kind: input, shape index: {}]   ;;  %s814_s4 = inlined_call_operand.vmem [shape: f32[128,128], index: 4, kind: output, shape index: {}]  }
   0x1 LB: > { %s567_s16 = sadd.s32 4294967295, %s705_s15   ;;  %p571_p0 = scmp.ge.s32.totalorder %s705_s15, 1  ;;  %s705_s15 = sphi %s732_s15, %s14_s15  }
   0x2   : > { %p163_p1 = scmp.lt.s32.totalorder %s705_s15, 3 }
   0x4   : > { %p164_p2 = pnand %p571_p0, %p163_p1 }
   0x5   : > { %v679_v0 = vld [vmem:[%s811_s1] sm:$0xff] (!%p164_p2)   ;;  %s572_s19 = sshll.u32 (!%p164_p2), %s567_s16, 3  ;;  %v680_v1 = vld [vmem:[%s811_s1 + $0x8] sm:$0xff] (!%p164_p2)   ;;  %v681_v2 = vld [vmem:[%s811_s1 + $0x10] sm:$0xff] (!%p164_p2)  }
   0x6   : > { %167 = sbr.rel (%p164_p2) target bundleno = 482 (0x1e2), region = 36  ;;  %p190_p3 = scmp.lt.s32.totalorder (!%p164_p2), %s572_s19, 15  ;;  %623 = vmatprep.subr.bf16.mxu0 (!%p164_p2), %v679_v0  ;;  %v682_v3 = vld [vmem:[%s811_s1 + $0x18] sm:$0xff] (!%p164_p2)   ;;  %v683_v5 = vld [vmem:[%s811_s1 + $0x20] sm:$0xff] (!%p164_p2)   ;;  %v692_v7 = vld [vmem:[%s812_s2 + $0x8] sm:$0xff] (!%p164_p2)  }
   0x7   : > { %624 = vmatpush3.bf16.msra.mxu0 (!%p164_p2), %v679_v0  ;;  %v691_v6 = vld [vmem:[%s812_s2] sm:$0xff] (!%p164_p2)   ;;  %v684_v8 = vld [vmem:[%s811_s1 + $0x28] sm:$0xff] (!%p164_p2)   ;;  %v693_v9 = vld [vmem:[%s812_s2 + $0x10] sm:$0xff] (!%p164_p2)  }
   0x8   : > { %625 = vmatprep.subr.bf16.mxu0 (!%p164_p2), %v680_v1  ;;  %647 = vmatprep.subr.bf16.mxu1 (!%p164_p2), %v691_v6  ;;  %v685_v10 = vld [vmem:[%s811_s1 + $0x30] sm:$0xff] (!%p164_p2)   ;;  %v694_v11 = vld [vmem:[%s812_s2 + $0x18] sm:$0xff] (!%p164_p2)   ;;  %v695_v13 = vld [vmem:[%s812_s2 + $0x20] sm:$0xff] (!%p164_p2)  }
   0x9   : > { %648 = vmatpush3.bf16.msra.mxu1 (!%p164_p2), %v691_v6  ;;  %v686_v12 = vld [vmem:[%s811_s1 + $0x38] sm:$0xff] (!%p164_p2)   ;;  %v696_v14 = vld [vmem:[%s812_s2 + $0x28] sm:$0xff] (!%p164_p2)   ;;  %v697_v17 = vld [vmem:[%s812_s2 + $0x30] sm:$0xff] (!%p164_p2)  }
   0xa   : > { %649 = vmatprep.subr.bf16.mxu1 (!%p164_p2), %v692_v7  ;;  %v698_v19 = vld [vmem:[%s812_s2 + $0x38] sm:$0xff] (!%p164_p2)   ;;  %v588_v32 = vld [vmem:[%s813_s3] ss:$0 sm:$0xff] (!%p164_p2) }
   0xb   : > { %626 = vmatpush3.bf16.msra.mxu0 (!%p164_p2), %v680_v1 }
   0xc   : > { %627 = vmatprep.subr.bf16.mxu0 (!%p164_p2), %v681_v2 }
   0xd   : > { %s816_s19 = smov (!%p190_p3, %s572_s19), 15  ;;  %650 = vmatpush3.bf16.msra.mxu1 %v692_v7 }
   0xe   : > { %s573_s24 = sshll.u32 %s816_s19, 2  ;;  %651 = vmatprep.subr.bf16.mxu1 %v693_v9 }
   0xf   : > { %s755_s27 = scalar_lea.vmem %s810_s0, %s573_s24  ;;  %628 = vmatpush3.bf16.msra.mxu0 %v681_v2 }
  0x10   : > { %v687_v4 = vld [vmem:[%s755_s27] sm:$0xff]   ;;  %629 = vmatprep.subr.bf16.mxu0 %v682_v3  ;;  %v688_v15 = vld [vmem:[%s755_s27 + $0x8] sm:$0xff]   ;;  %v689_v16 = vld [vmem:[%s755_s27 + $0x10] sm:$0xff]  }
  0x11   : > { %639 = vmatprep.mubr.bf16.mxu0 %v687_v4  ;;  %652 = vmatpush3.bf16.msra.mxu1 %v693_v9  ;;  %v690_v18 = vld [vmem:[%s755_s27 + $0x18] sm:$0xff]   ;;  %s575_s27 = sshll.u32 %s816_s19, 3 }
  0x12   : > { %653 = vmatprep.subr.bf16.mxu1 %v694_v11  ;;  %s199_s9 = scalar_lea.vmem %s814_s4, %s575_s27 }
  0x13   : > { %630 = vmatpush3.bf16.msra.mxu0 %v682_v3 }
  0x14   : > { %631 = vmatprep.subr.bf16.mxu0 %v683_v5 }
  0x15   : > { %654 = vmatpush3.bf16.msra.mxu1 %v694_v11 }
  0x16   : > { %655 = vmatprep.subr.bf16.mxu1 %v695_v13 }
  0x17   : > { %632 = vmatpush3.bf16.msra.mxu0 %v683_v5 }
  0x18   : > { %633 = vmatprep.subr.bf16.mxu0 %v684_v8 }
  0x19   : > { %656 = vmatpush3.bf16.msra.mxu1 %v695_v13 }
  0x1a   : > { %657 = vmatprep.subr.bf16.mxu1 %v696_v14 }
  0x1b   : > { %634 = vmatpush3.bf16.msra.mxu0 %v684_v8 }
  0x1c   : > { %635 = vmatprep.subr.bf16.mxu0 %v685_v10 }
  0x1d   : > { %658 = vmatpush3.bf16.msra.mxu1 %v696_v14 }
  0x1e   : > { %659 = vmatprep.subr.bf16.mxu1 %v697_v17 }
  0x1f   : > { %636 = vmatpush3.bf16.msra.mxu0 %v685_v10 }
  0x20   : > { %637 = vmatprep.subr.bf16.mxu0 %v686_v12 }
  0x21   : > { %660 = vmatpush3.bf16.msra.mxu1 %v697_v17 }
  0x22   : > { %661 = vmatprep.subr.bf16.mxu1 %v698_v19 }
  0x23   : > { %638 = vmatpush3.bf16.msra.mxu0 %v686_v12 }
  0x25   : > { %662 = vmatpush3.bf16.msra.mxu1 %v698_v19 }
  0x26   : > { %640 = vmatmul.mubr.bf16.vlgmr.msra.gmra.mrb[0].mxu0 %v688_v15 }
  0x27   : > { %643 = vmatprep.mubr.bf16.mxu0 %v689_v16 }
  0x2e   : > { %644 = vmatmul.mubr.bf16.gmra.mrb[4].mxu0 %v690_v18 }
  0xf9   : > { %v641_v20 = vpop.f32.mrb[0].mxu0 }
  0xfa   : > { %v332_v21 = vpop.f32.mrb[1].mxu0 }
  0xfb   : > { %v642_v22 = vpop.f32.mrb[2].mxu0 }
  0xfc   : > { %v364_v23 = vpack.c.bf16 %v642_v22, %v641_v20  ;;  %v335_v24 = vpop.f32.mrb[3].mxu0 }
  0xfd   : > { %v363_v25 = vpack.c.bf16 %v335_v24, %v332_v21 }
  0xff   : > { %663 = vmatprep.mubr.bf16.mxu1 %v363_v25 }
 0x100   : > { %664 = vmatmul.mubr.bf16.vlgmr.msra.gmra.mrb[0].mxu1 %v364_v23 }
 0x101   : > { %v645_v26 = vpop.f32.mrb[4].mxu0 }
 0x102   : > { %v348_v27 = vpop.f32.mrb[5].mxu0 }
 0x103   : > { %v646_v28 = vpop.f32.mrb[6].mxu0 }
 0x104   : > { %v366_v29 = vpack.c.bf16 %v646_v28, %v645_v26  ;;  %v351_v30 = vpop.f32.mrb[7].mxu0 }
 0x105   : > { %v365_v31 = vpack.c.bf16 %v351_v30, %v348_v27 }
 0x107   : > { %667 = vmatprep.mubr.bf16.mxu1 %v365_v31 }
 0x108   : > { %668 = vmatmul.mubr.bf16.gmra.mrb[4].mxu1 %v366_v29 }
 0x1d3   : > { %v665_v33 = vpop.f32.mrb[0].mxu1 }
 0x1d4   : > { %v481_v34 = vadd.f32 %v665_v33, %v588_v32  ;;  %v472_v35 = vpop.f32.mrb[1].mxu1 }
 0x1d5   : > { %v473_v36 = vadd.f32 %v588_v32, %v472_v35  ;;  %v666_v37 = vpop.f32.mrb[2].mxu1 }
 0x1d6   : > { %505 = vst [vmem:[%s199_s9 + $0x10] sm:$0xff] %v481_v34  ;;  %v484_v38 = vadd.f32 %v666_v37, %v588_v32  ;;  %v475_v39 = vpop.f32.mrb[3].mxu1 }
 0x1d7   : > { %503 = vst [vmem:[%s199_s9] sm:$0xff] %v473_v36  ;;  %v476_v40 = vadd.f32 %v588_v32, %v475_v39 }
 0x1d8   : > { %506 = vst [vmem:[%s199_s9 + $0x18] sm:$0xff] %v484_v38 }
 0x1d9   : > { %504 = vst [vmem:[%s199_s9 + $0x8] sm:$0xff] %v476_v40 }
 0x1db   : > { %v669_v41 = vpop.f32.mrb[4].mxu1 }
 0x1dc   : > { %v497_v42 = vadd.f32 %v669_v41, %v588_v32  ;;  %v488_v43 = vpop.f32.mrb[5].mxu1 }
 0x1dd   : > { %v489_v44 = vadd.f32 %v588_v32, %v488_v43  ;;  %v670_v45 = vpop.f32.mrb[6].mxu1 }
 0x1de   : > { %509 = vst [vmem:[%s199_s9 + $0x30] sm:$0xff] %v497_v42  ;;  %v500_v46 = vadd.f32 %v670_v45, %v588_v32  ;;  %v491_v47 = vpop.f32.mrb[7].mxu1 }
 0x1df   : > { %507 = vst [vmem:[%s199_s9 + $0x20] sm:$0xff] %v489_v44  ;;  %v492_v48 = vadd.f32 %v588_v32, %v491_v47 }
 0x1e0   : > { %510 = vst [vmem:[%s199_s9 + $0x38] sm:$0xff] %v500_v46 }
 0x1e1   : > { %508 = vst [vmem:[%s199_s9 + $0x28] sm:$0xff] %v492_v48 }
 0x1e2 PF: > { %s14_s15 = sadd.s32 1, %s705_s15  }
 0x1e3   : > { %p11_p4 = scmp.ge.s32.totalorder %s14_s15, 4  }
 0x1e5   :  { %13 = sbr.rel (!%p11_p4) target bundleno = 1 (0x1), region = 66 }

</bundles_post_ra>
